<compile_context>
chip_gen: v7x
topology: tpu7x:2x2x1
jax: 0.10.0
libtpu: 0.0.40
codegen_flags: <defaults>
</compile_context>

<pallas_src>
import math

import jax
import jax.numpy as jnp
from jax import lax
from jax.experimental import pallas as pl
from jax.experimental.pallas import tpu as pltpu


# ----------------------------------------------------------------------------
# Pallas kernel factory: one batch element per grid step, head loop in-kernel.
# ----------------------------------------------------------------------------
def _make_kernel(L, E, H, hd, V, pad_token, has_attn_mask, has_kpm):
    def kernel(x_ref, edge_ref, attn_ref, kpm_ref, wqkv_ref, bqkv_ref,
               wot_ref, bo_ref, emb_ref, out_ref, ao_scratch):
        # ---- fused q/k/v projection: bf16 MXU operands, f32 accumulation ----
        # 1/sqrt(hd) is already folded into the q columns of wqkv / bqkv.
        x = x_ref[0]                                              # [L, E] bf16
        qkv = jnp.dot(x, wqkv_ref[...],
                      preferred_element_type=jnp.float32) + bqkv_ref[...]  # [L,3E] f32

        # ---- head-independent additive mask bias, built in-kernel (f32) ----
        # PyTorch semantics: key_padding_mask only applies when attn_mask is
        # given; both branches are static (baked at trace time).
        if has_attn_mask:
            bias = attn_ref[...]                                  # [L, L] 0 / -inf
            if has_kpm:
                kpm_row = kpm_ref[0]                              # [1, L] int32
                bias = jnp.where(kpm_row != 0, -jnp.inf, bias)
        else:
            bias = None

        # ---- edge-token one-hot masks: shared across heads, pad row skipped
        # (nn.Embedding(padding_idx=...) keeps that row identically zero) ----
        edge_i = edge_ref[0].astype(jnp.int32)                    # [L, L]
        tok_masks = {tok: (edge_i == tok) for tok in range(V) if tok != pad_token}

        for h in range(H):          # static unroll (fine for H<=8; fori beyond)
            q = qkv[:, h * hd:(h + 1) * hd]                       # [L, hd] f32
            k = qkv[:, E + h * hd:E + (h + 1) * hd]
            v = qkv[:, 2 * E + h * hd:2 * E + (h + 1) * hd]

            # scores = q @ k^T, contracting last dims (no in-kernel transpose);
            # bf16 operands, f32 accumulation.
            s = lax.dot_general(q.astype(jnp.bfloat16), k.astype(jnp.bfloat16),
                                (((1,), (1,)), ((), ())),
                                preferred_element_type=jnp.float32)  # [L, L]

            if bias is not None:
                s = s + bias

            # in-kernel edge-embedding lookup from the SMEM table (V-1 selects;
            # at production L/V this should be a one-hot @ [V,H] MXU matmul).
            eb = jnp.zeros_like(s)
            for tok, tmask in tok_masks.items():
                eb = eb + jnp.where(tmask, emb_ref[tok, h], 0.0)
            s = s + eb

            # row-wise softmax kept in f32 (v5e has no bf16 VPU/EUP); divide
            # on the EUP.  NOTE: fully key-padded rows would yield NaN exactly
            # as the PyTorch reference does; demo inputs avoid that case.
            m = jnp.max(s, axis=-1, keepdims=True)
            p = jnp.exp(s - m)
            denom = jnp.sum(p, axis=-1, keepdims=True)
            attn = p * pl.reciprocal(denom, approx=True)

            ao = jnp.dot(attn.astype(jnp.bfloat16), v.astype(jnp.bfloat16),
                         preferred_element_type=jnp.float32)      # [L, hd]
            ao_scratch[:, h * hd:(h + 1) * hd] = ao

        # single full-width output projection + bias, one store per grid step
        out = jnp.dot(ao_scratch[...].astype(jnp.bfloat16), wot_ref[...],
                      preferred_element_type=jnp.float32) + bo_ref[...]
        out_ref[0] = out.astype(out_ref.dtype)

    return kernel


# ----------------------------------------------------------------------------
# Wrapper: parameter pre-transposes, dtype prep, pallas_call plumbing.
# ----------------------------------------------------------------------------
def graph_attention_pallas(params, x, edge, key_padding_mask=None, attn_mask=None):
    """x: [L, B, E] float32, edge: [B, L, L] int.  Returns [L, B, E] float32."""
    L, B, E = x.shape
    H = params["num_heads"]
    hd = E // H
    pad_token = params["edge_pad_token"]
    edge_emb = params["edge_emb"].astype(jnp.float32)              # [V, H]
    V = edge_emb.shape[0]

    # ---- weights: pre-transpose, fold 1/sqrt(hd) into q, cast MXU sides bf16
    scale = 1.0 / math.sqrt(hd)
    w_qkv = jnp.transpose(params["in_proj_w"]).astype(jnp.float32)  # [E, 3E]
    w_qkv = w_qkv.at[:, :E].multiply(scale)
    b_qkv = params["in_proj_b"].astype(jnp.float32).at[:E].multiply(scale)
    b_qkv = b_qkv.reshape(1, 3 * E)                                 # f32 (post-acc add)
    wo_t = jnp.transpose(params["out_proj_w"]).astype(jnp.float32)  # [E, E]
    bo = params["out_proj_b"].astype(jnp.float32).reshape(1, E)

    w_qkv_bf = w_qkv.astype(jnp.bfloat16)
    wo_bf = wo_t.astype(jnp.bfloat16)
    x_ble = jnp.transpose(x, (1, 0, 2)).astype(jnp.bfloat16)        # [B, L, E] bf16
    edge_i8 = edge.astype(jnp.int8)                                 # [B, L, L] int8

    # ---- masks stay small: attn_mask [L,L] resident, kpm [B,1,L] int32 ------
    has_attn = attn_mask is not None
    has_kpm = has_attn and (key_padding_mask is not None)
    am = (attn_mask.astype(jnp.float32) if has_attn
          else jnp.zeros((L, L), jnp.float32))
    kpm = (key_padding_mask.astype(jnp.int32).reshape(B, 1, L) if has_kpm
           else jnp.zeros((B, 1, L), jnp.int32))

    kernel = _make_kernel(L, E, H, hd, V, pad_token, has_attn, has_kpm)

    out = pl.pallas_call(
        kernel,
        out_shape=jax.ShapeDtypeStruct((B, L, E), jnp.float32),
        grid_spec=pltpu.PrefetchScalarGridSpec(
            num_scalar_prefetch=0,
            grid=(B,),
            in_specs=[
                pl.BlockSpec((1, L, E), lambda b: (b, 0, 0)),          # x (bf16)
                pl.BlockSpec((1, L, L), lambda b: (b, 0, 0)),          # edge (int8)
                pl.BlockSpec((L, L), lambda b: (0, 0)),                # attn_mask (resident)
                pl.BlockSpec((1, 1, L), lambda b: (b, 0, 0)),          # key_padding_mask
                pl.BlockSpec((E, 3 * E), lambda b: (0, 0)),            # w_qkv (resident, bf16)
                pl.BlockSpec((1, 3 * E), lambda b: (0, 0)),            # b_qkv (resident, f32)
                pl.BlockSpec((E, E), lambda b: (0, 0)),                # Wo^T  (resident, bf16)
                pl.BlockSpec((1, E), lambda b: (0, 0)),                # bo    (resident, f32)
                pl.BlockSpec(memory_space=pltpu.MemorySpace.SMEM),     # edge_emb table [V,H]
            ],
            out_specs=pl.BlockSpec((1, L, E), lambda b: (b, 0, 0)),
            scratch_shapes=[pltpu.VMEM((L, E), jnp.float32)],          # per-head ao slab
        ),
        compiler_params=pltpu.CompilerParams(
            dimension_semantics=("parallel",),
            vmem_limit_bytes=32 * 1024 * 1024),
    )(x_ble, edge_i8, am, kpm, w_qkv_bf, b_qkv, wo_bf, bo, edge_emb)

    return jnp.transpose(out, (1, 0, 2))                              # [L, B, E]


# ----------------------------------------------------------------------------
# Pure-JAX reference (mirrors the PyTorch forward, exact f32) for verification.
# ----------------------------------------------------------------------------
def graph_attention_reference(params, x, edge, key_padding_mask=None, attn_mask=None):
    L, B, E = x.shape
    H = params["num_heads"]
    hd = E // H

    qkv = x @ params["in_proj_w"].T + params["in_proj_b"]             # [L, B, 3E]
    q, k, v = jnp.split(qkv, 3, axis=-1)
    q = jnp.transpose(q.reshape(L, B * H, hd), (1, 0, 2))
    k = jnp.transpose(k.reshape(L, B * H, hd), (1, 0, 2))
    v = jnp.transpose(v.reshape(L, B * H, hd), (1, 0, 2))

    am = None
    if attn_mask is not None:
        am = jnp.broadcast_to(attn_mask.astype(jnp.float32)[None], (1, L, L))
        if key_padding_mask is not None:
            kpm = key_padding_mask.astype(bool).reshape(B, 1, 1, L)
            kpm = jnp.broadcast_to(kpm, (B, H, 1, L)).reshape(B * H, 1, L)
            am = jnp.where(kpm, -jnp.inf, am)

    edge_emb = jnp.take(params["edge_emb"], edge, axis=0)             # [B, L, L, H]
    edge_emb = jnp.transpose(edge_emb, (0, 3, 1, 2)).reshape(B * H, L, L)

    q = q / math.sqrt(hd)
    aw = q @ jnp.swapaxes(k, -2, -1)
    if am is not None:
        aw = aw + am
    aw = aw + edge_emb
    aw = jax.nn.softmax(aw, axis=-1)
    ao = aw @ v
    ao = jnp.transpose(ao, (1, 0, 2)).reshape(L, B, E)
    return ao @ params["out_proj_w"].T + params["out_proj_b"]


# ----------------------------------------------------------------------------
# Deterministic parameter init + demo run.
# ----------------------------------------------------------------------------
def init_params(key, embed_dim, num_heads, edge_voc_size, edge_pad_token):
    k1, k2, k3, k4, k5 = jax.random.split(key, 5)
    scale = 1.0 / math.sqrt(embed_dim)
    in_proj_w = jax.random.normal(k1, (3 * embed_dim, embed_dim), jnp.float32) * scale
    in_proj_b = jax.random.normal(k2, (3 * embed_dim,), jnp.float32) * 0.02
    out_proj_w = jax.random.normal(k3, (embed_dim, embed_dim), jnp.float32) * scale
    out_proj_b = jax.random.normal(k4, (embed_dim,), jnp.float32) * 0.02
    edge_emb = jax.random.normal(k5, (edge_voc_size, num_heads), jnp.float32) * 0.1
    # padding_idx row is zero, as in nn.Embedding(padding_idx=...)
    edge_emb = edge_emb.at[edge_pad_token].set(0.0)
    return {
        "num_heads": num_heads,
        "edge_pad_token": edge_pad_token,
        "in_proj_w": in_proj_w,
        "in_proj_b": in_proj_b,
        "out_proj_w": out_proj_w,
        "out_proj_b": out_proj_b,
        "edge_emb": edge_emb,
    }


if __name__ == "__main__":
    L, B, E, H = 8, 2, 32, 4
    edge_voc_size, edge_pad_token = 5, 0

    key = jax.random.PRNGKey(0)
    kp, kx, ke = jax.random.split(key, 3)

    params = init_params(kp, E, H, edge_voc_size, edge_pad_token)

    x = jax.random.normal(kx, (L, B, E), jnp.float32)
    edge = jax.random.randint(ke, (B, L, L), 0, edge_voc_size, jnp.int32)

    # causal additive mask (0 / -inf), like generate_square_subsequent_mask
    causal = jnp.where(jnp.tril(jnp.ones((L, L), bool)), 0.0, -jnp.inf).astype(jnp.float32)
    # pad the last two positions of batch 1 (no fully-masked rows arise)
    key_padding_mask = jnp.zeros((B, L), bool).at[1, L - 2:].set(True)

    out = graph_attention_pallas(params, x, edge,
                                 key_padding_mask=key_padding_mask,
                                 attn_mask=causal)
    out = jax.block_until_ready(out)

    ref = graph_attention_reference(params, x, edge,
                                    key_padding_mask=key_padding_mask,
                                    attn_mask=causal)

    assert out.shape == (L, B, E)
    # bf16 MXU operands (f32 accumulation) vs the exact-f32 reference: widen
    # the tolerance accordingly.
    assert jnp.allclose(out, ref, atol=5e-2, rtol=5e-2), "mismatch vs reference"

    print("KERNEL_OK")
</pallas_src>

<mosaic_0001>
module attributes {stable_mosaic.version = 11 : i64} {
  func.func @kernel(%arg0: i32, %arg1: memref<1x8x32xbf16, #tpu.memory_space<vmem>>, %arg2: memref<1x8x8xi8, #tpu.memory_space<vmem>>, %arg3: memref<8x8xf32, #tpu.memory_space<vmem>>, %arg4: memref<1x1x8xi32, #tpu.memory_space<vmem>>, %arg5: memref<32x96xbf16, #tpu.memory_space<vmem>>, %arg6: memref<1x96xf32, #tpu.memory_space<vmem>>, %arg7: memref<32x32xbf16, #tpu.memory_space<vmem>>, %arg8: memref<1x32xf32, #tpu.memory_space<vmem>>, %arg9: memref<5x4xf32, #tpu.memory_space<smem>>, %arg10: memref<1x8x32xf32, #tpu.memory_space<vmem>>, %arg11: memref<8x32xf32, #tpu.memory_space<vmem>>) attributes {dimension_semantics = [#tpu.dimension_semantics<parallel>], iteration_bounds = array<i64: 2>, scalar_prefetch = 0 : i64, scratch_operands = 1 : i64, tpu.core_type = #tpu.core_type<tc>, window_params = [{transform_indices = @transform_0, window_bounds = array<i64: 1, 8, 32>}, {transform_indices = @transform_1, window_bounds = array<i64: 1, 8, 8>}, {pipeline_mode = #tpu.pipeline_mode<synchronous>, transform_indices = @transform_2, window_bounds = array<i64: 8, 8>}, {transform_indices = @transform_3, window_bounds = array<i64: 1, 1, 8>}, {pipeline_mode = #tpu.pipeline_mode<synchronous>, transform_indices = @transform_4, window_bounds = array<i64: 32, 96>}, {pipeline_mode = #tpu.pipeline_mode<synchronous>, transform_indices = @transform_5, window_bounds = array<i64: 1, 96>}, {pipeline_mode = #tpu.pipeline_mode<synchronous>, transform_indices = @transform_6, window_bounds = array<i64: 32, 32>}, {pipeline_mode = #tpu.pipeline_mode<synchronous>, transform_indices = @transform_7, window_bounds = array<i64: 1, 32>}, {transform_indices = @transform_8, window_bounds = array<i64: 5, 4>}, {transform_indices = @transform_9, window_bounds = array<i64: 1, 8, 32>}]} {
    %c0 = arith.constant 0 : index
    %c0_0 = arith.constant 0 : index
    %c0_1 = arith.constant 0 : index
    %0 = vector.load %arg1[%c0, %c0_0, %c0_1] : memref<1x8x32xbf16, #tpu.memory_space<vmem>>, vector<1x8x32xbf16>
    %1 = vector.shape_cast %0 : vector<1x8x32xbf16> to vector<8x32xbf16>
    %c0_2 = arith.constant 0 : index
    %c0_3 = arith.constant 0 : index
    %2 = vector.load %arg5[%c0_2, %c0_3] : memref<32x96xbf16, #tpu.memory_space<vmem>>, vector<32x96xbf16>
    %cst = arith.constant dense<0.000000e+00> : vector<8x96xf32>
    %3 = tpu.matmul %1, %2, %cst {dimension_numbers = #tpu.dot_dimension_numbers<[1], [0], [0], [1], [0, 0, 1, 1], [], []>} : vector<8x32xbf16>, vector<32x96xbf16>, vector<8x96xf32> -> vector<8x96xf32>
    %c0_4 = arith.constant 0 : index
    %c0_5 = arith.constant 0 : index
    %4 = vector.load %arg6[%c0_4, %c0_5] : memref<1x96xf32, #tpu.memory_space<vmem>>, vector<1x96xf32>
    %5 = vector.broadcast %4 : vector<1x96xf32> to vector<8x96xf32>
    %6 = arith.addf %3, %5 : vector<8x96xf32>
    %c0_6 = arith.constant 0 : index
    %c0_7 = arith.constant 0 : index
    %7 = vector.load %arg3[%c0_6, %c0_7] : memref<8x8xf32, #tpu.memory_space<vmem>>, vector<8x8xf32>
    %c0_8 = arith.constant 0 : index
    %c0_9 = arith.constant 0 : index
    %c0_10 = arith.constant 0 : index
    %8 = vector.load %arg4[%c0_8, %c0_9, %c0_10] : memref<1x1x8xi32, #tpu.memory_space<vmem>>, vector<1x1x8xi32>
    %9 = vector.shape_cast %8 : vector<1x1x8xi32> to vector<1x8xi32>
    %c0_i32 = arith.constant 0 : i32
    %10 = vector.broadcast %c0_i32 : i32 to vector<1x8xi32>
    %11 = arith.cmpi ne, %9, %10 : vector<1x8xi32>
    %cst_11 = arith.constant 0xFF800000 : f32
    %12 = vector.shape_cast %11 : vector<1x8xi1> to vector<1x8xi1>
    %13 = vector.broadcast %12 : vector<1x8xi1> to vector<8x8xi1>
    %14 = vector.broadcast %cst_11 : f32 to vector<8x8xf32>
    %15 = arith.select %13, %14, %7 : vector<8x8xi1>, vector<8x8xf32>
    %c0_12 = arith.constant 0 : index
    %c0_13 = arith.constant 0 : index
    %c0_14 = arith.constant 0 : index
    %16 = vector.load %arg2[%c0_12, %c0_13, %c0_14] : memref<1x8x8xi8, #tpu.memory_space<vmem>>, vector<1x8x8xi8>
    %17 = vector.shape_cast %16 : vector<1x8x8xi8> to vector<8x8xi8>
    %18 = arith.extsi %17 : vector<8x8xi8> to vector<8x8xi32>
    %c1_i32 = arith.constant 1 : i32
    %19 = vector.broadcast %c1_i32 : i32 to vector<8x8xi32>
    %20 = arith.cmpi eq, %18, %19 : vector<8x8xi32>
    %c2_i32 = arith.constant 2 : i32
    %21 = vector.broadcast %c2_i32 : i32 to vector<8x8xi32>
    %22 = arith.cmpi eq, %18, %21 : vector<8x8xi32>
    %c3_i32 = arith.constant 3 : i32
    %23 = vector.broadcast %c3_i32 : i32 to vector<8x8xi32>
    %24 = arith.cmpi eq, %18, %23 : vector<8x8xi32>
    %c4_i32 = arith.constant 4 : i32
    %25 = vector.broadcast %c4_i32 : i32 to vector<8x8xi32>
    %26 = arith.cmpi eq, %18, %25 : vector<8x8xi32>
    %27 = vector.extract_strided_slice %6 {offsets = [0, 0], sizes = [8, 8], strides = [1, 1]} : vector<8x96xf32> to vector<8x8xf32>
    %28 = vector.extract_strided_slice %6 {offsets = [0, 32], sizes = [8, 8], strides = [1, 1]} : vector<8x96xf32> to vector<8x8xf32>
    %29 = vector.extract_strided_slice %6 {offsets = [0, 64], sizes = [8, 8], strides = [1, 1]} : vector<8x96xf32> to vector<8x8xf32>
    %30 = arith.truncf %27 : vector<8x8xf32> to vector<8x8xbf16>
    %31 = arith.truncf %28 : vector<8x8xf32> to vector<8x8xbf16>
    %cst_15 = arith.constant dense<0.000000e+00> : vector<8x8xf32>
    %32 = tpu.matmul %30, %31, %cst_15 {dimension_numbers = #tpu.dot_dimension_numbers<[1], [1], [0], [0], [0, 0, 1, 0], [], []>} : vector<8x8xbf16>, vector<8x8xbf16>, vector<8x8xf32> -> vector<8x8xf32>
    %33 = arith.addf %32, %15 : vector<8x8xf32>
    %cst_16 = arith.constant 0.000000e+00 : f32
    %34 = vector.broadcast %cst_16 : f32 to vector<8x8xf32>
    %c1 = arith.constant 1 : index
    %c0_17 = arith.constant 0 : index
    %35 = memref.load %arg9[%c1, %c0_17] : memref<5x4xf32, #tpu.memory_space<smem>>
    %cst_18 = arith.constant 0.000000e+00 : f32
    %36 = vector.broadcast %35 : f32 to vector<8x8xf32>
    %37 = vector.broadcast %cst_18 : f32 to vector<8x8xf32>
    %38 = arith.select %20, %36, %37 : vector<8x8xi1>, vector<8x8xf32>
    %39 = arith.addf %34, %38 : vector<8x8xf32>
    %c2 = arith.constant 2 : index
    %c0_19 = arith.constant 0 : index
    %40 = memref.load %arg9[%c2, %c0_19] : memref<5x4xf32, #tpu.memory_space<smem>>
    %cst_20 = arith.constant 0.000000e+00 : f32
    %41 = vector.broadcast %40 : f32 to vector<8x8xf32>
    %42 = vector.broadcast %cst_20 : f32 to vector<8x8xf32>
    %43 = arith.select %22, %41, %42 : vector<8x8xi1>, vector<8x8xf32>
    %44 = arith.addf %39, %43 : vector<8x8xf32>
    %c3 = arith.constant 3 : index
    %c0_21 = arith.constant 0 : index
    %45 = memref.load %arg9[%c3, %c0_21] : memref<5x4xf32, #tpu.memory_space<smem>>
    %cst_22 = arith.constant 0.000000e+00 : f32
    %46 = vector.broadcast %45 : f32 to vector<8x8xf32>
    %47 = vector.broadcast %cst_22 : f32 to vector<8x8xf32>
    %48 = arith.select %24, %46, %47 : vector<8x8xi1>, vector<8x8xf32>
    %49 = arith.addf %44, %48 : vector<8x8xf32>
    %c4 = arith.constant 4 : index
    %c0_23 = arith.constant 0 : index
    %50 = memref.load %arg9[%c4, %c0_23] : memref<5x4xf32, #tpu.memory_space<smem>>
    %cst_24 = arith.constant 0.000000e+00 : f32
    %51 = vector.broadcast %50 : f32 to vector<8x8xf32>
    %52 = vector.broadcast %cst_24 : f32 to vector<8x8xf32>
    %53 = arith.select %26, %51, %52 : vector<8x8xi1>, vector<8x8xf32>
    %54 = arith.addf %49, %53 : vector<8x8xf32>
    %55 = arith.addf %33, %54 : vector<8x8xf32>
    %cst_25 = arith.constant dense<0xFF800000> : vector<8xf32>
    %56 = vector.multi_reduction <maximumf>, %55, %cst_25 [1] : vector<8x8xf32> to vector<8xf32>
    %57 = vector.shape_cast %56 : vector<8xf32> to vector<8x1xf32>
    %58 = vector.broadcast %57 : vector<8x1xf32> to vector<8x8xf32>
    %59 = arith.subf %55, %58 : vector<8x8xf32>
    %60 = math.exp %59 : vector<8x8xf32>
    %cst_26 = arith.constant dense<0.000000e+00> : vector<8xf32>
    %61 = vector.multi_reduction <add>, %60, %cst_26 [1] : vector<8x8xf32> to vector<8xf32>
    %62 = vector.shape_cast %61 : vector<8xf32> to vector<8x1xf32>
    %63 = tpu.reciprocal %62 {approx = true} : vector<8x1xf32> -> vector<8x1xf32>
    %64 = vector.broadcast %63 : vector<8x1xf32> to vector<8x8xf32>
    %65 = arith.mulf %60, %64 : vector<8x8xf32>
    %66 = arith.truncf %65 : vector<8x8xf32> to vector<8x8xbf16>
    %67 = arith.truncf %29 : vector<8x8xf32> to vector<8x8xbf16>
    %cst_27 = arith.constant dense<0.000000e+00> : vector<8x8xf32>
    %68 = tpu.matmul %66, %67, %cst_27 {dimension_numbers = #tpu.dot_dimension_numbers<[1], [0], [0], [1], [0, 0, 1, 1], [], []>} : vector<8x8xbf16>, vector<8x8xbf16>, vector<8x8xf32> -> vector<8x8xf32>
    %c0_28 = arith.constant 0 : index
    %c0_29 = arith.constant 0 : index
    %69 = vector.load %arg11[%c0_28, %c0_29] : memref<8x32xf32, #tpu.memory_space<vmem>>, vector<8x8xf32>
    tpu.vector_store %arg11[%c0_28, %c0_29], %68 {strides = array<i32>} : memref<8x32xf32, #tpu.memory_space<vmem>>, vector<8x8xf32>,
    %70 = vector.extract_strided_slice %6 {offsets = [0, 8], sizes = [8, 8], strides = [1, 1]} : vector<8x96xf32> to vector<8x8xf32>
    %71 = vector.extract_strided_slice %6 {offsets = [0, 40], sizes = [8, 8], strides = [1, 1]} : vector<8x96xf32> to vector<8x8xf32>
    %72 = vector.extract_strided_slice %6 {offsets = [0, 72], sizes = [8, 8], strides = [1, 1]} : vector<8x96xf32> to vector<8x8xf32>
    %73 = arith.truncf %70 : vector<8x8xf32> to vector<8x8xbf16>
    %74 = arith.truncf %71 : vector<8x8xf32> to vector<8x8xbf16>
    %cst_30 = arith.constant dense<0.000000e+00> : vector<8x8xf32>
    %75 = tpu.matmul %73, %74, %cst_30 {dimension_numbers = #tpu.dot_dimension_numbers<[1], [1], [0], [0], [0, 0, 1, 0], [], []>} : vector<8x8xbf16>, vector<8x8xbf16>, vector<8x8xf32> -> vector<8x8xf32>
    %76 = arith.addf %75, %15 : vector<8x8xf32>
    %cst_31 = arith.constant 0.000000e+00 : f32
    %77 = vector.broadcast %cst_31 : f32 to vector<8x8xf32>
    %c1_32 = arith.constant 1 : index
    %c1_33 = arith.constant 1 : index
    %78 = memref.load %arg9[%c1_32, %c1_33] : memref<5x4xf32, #tpu.memory_space<smem>>
    %cst_34 = arith.constant 0.000000e+00 : f32
    %79 = vector.broadcast %78 : f32 to vector<8x8xf32>
    %80 = vector.broadcast %cst_34 : f32 to vector<8x8xf32>
    %81 = arith.select %20, %79, %80 : vector<8x8xi1>, vector<8x8xf32>
    %82 = arith.addf %77, %81 : vector<8x8xf32>
    %c2_35 = arith.constant 2 : index
    %c1_36 = arith.constant 1 : index
    %83 = memref.load %arg9[%c2_35, %c1_36] : memref<5x4xf32, #tpu.memory_space<smem>>
    %cst_37 = arith.constant 0.000000e+00 : f32
    %84 = vector.broadcast %83 : f32 to vector<8x8xf32>
    %85 = vector.broadcast %cst_37 : f32 to vector<8x8xf32>
    %86 = arith.select %22, %84, %85 : vector<8x8xi1>, vector<8x8xf32>
    %87 = arith.addf %82, %86 : vector<8x8xf32>
    %c3_38 = arith.constant 3 : index
    %c1_39 = arith.constant 1 : index
    %88 = memref.load %arg9[%c3_38, %c1_39] : memref<5x4xf32, #tpu.memory_space<smem>>
    %cst_40 = arith.constant 0.000000e+00 : f32
    %89 = vector.broadcast %88 : f32 to vector<8x8xf32>
    %90 = vector.broadcast %cst_40 : f32 to vector<8x8xf32>
    %91 = arith.select %24, %89, %90 : vector<8x8xi1>, vector<8x8xf32>
    %92 = arith.addf %87, %91 : vector<8x8xf32>
    %c4_41 = arith.constant 4 : index
    %c1_42 = arith.constant 1 : index
    %93 = memref.load %arg9[%c4_41, %c1_42] : memref<5x4xf32, #tpu.memory_space<smem>>
    %cst_43 = arith.constant 0.000000e+00 : f32
    %94 = vector.broadcast %93 : f32 to vector<8x8xf32>
    %95 = vector.broadcast %cst_43 : f32 to vector<8x8xf32>
    %96 = arith.select %26, %94, %95 : vector<8x8xi1>, vector<8x8xf32>
    %97 = arith.addf %92, %96 : vector<8x8xf32>
    %98 = arith.addf %76, %97 : vector<8x8xf32>
    %cst_44 = arith.constant dense<0xFF800000> : vector<8xf32>
    %99 = vector.multi_reduction <maximumf>, %98, %cst_44 [1] : vector<8x8xf32> to vector<8xf32>
    %100 = vector.shape_cast %99 : vector<8xf32> to vector<8x1xf32>
    %101 = vector.broadcast %100 : vector<8x1xf32> to vector<8x8xf32>
    %102 = arith.subf %98, %101 : vector<8x8xf32>
    %103 = math.exp %102 : vector<8x8xf32>
    %cst_45 = arith.constant dense<0.000000e+00> : vector<8xf32>
    %104 = vector.multi_reduction <add>, %103, %cst_45 [1] : vector<8x8xf32> to vector<8xf32>
    %105 = vector.shape_cast %104 : vector<8xf32> to vector<8x1xf32>
    %106 = tpu.reciprocal %105 {approx = true} : vector<8x1xf32> -> vector<8x1xf32>
    %107 = vector.broadcast %106 : vector<8x1xf32> to vector<8x8xf32>
    %108 = arith.mulf %103, %107 : vector<8x8xf32>
    %109 = arith.truncf %108 : vector<8x8xf32> to vector<8x8xbf16>
    %110 = arith.truncf %72 : vector<8x8xf32> to vector<8x8xbf16>
    %cst_46 = arith.constant dense<0.000000e+00> : vector<8x8xf32>
    %111 = tpu.matmul %109, %110, %cst_46 {dimension_numbers = #tpu.dot_dimension_numbers<[1], [0], [0], [1], [0, 0, 1, 1], [], []>} : vector<8x8xbf16>, vector<8x8xbf16>, vector<8x8xf32> -> vector<8x8xf32>
    %c0_47 = arith.constant 0 : index
    %c8 = arith.constant 8 : index
    %112 = vector.load %arg11[%c0_47, %c8] : memref<8x32xf32, #tpu.memory_space<vmem>>, vector<8x8xf32>
    tpu.vector_store %arg11[%c0_47, %c8], %111 {strides = array<i32>} : memref<8x32xf32, #tpu.memory_space<vmem>>, vector<8x8xf32>,
    %113 = vector.extract_strided_slice %6 {offsets = [0, 16], sizes = [8, 8], strides = [1, 1]} : vector<8x96xf32> to vector<8x8xf32>
    %114 = vector.extract_strided_slice %6 {offsets = [0, 48], sizes = [8, 8], strides = [1, 1]} : vector<8x96xf32> to vector<8x8xf32>
    %115 = vector.extract_strided_slice %6 {offsets = [0, 80], sizes = [8, 8], strides = [1, 1]} : vector<8x96xf32> to vector<8x8xf32>
    %116 = arith.truncf %113 : vector<8x8xf32> to vector<8x8xbf16>
    %117 = arith.truncf %114 : vector<8x8xf32> to vector<8x8xbf16>
    %cst_48 = arith.constant dense<0.000000e+00> : vector<8x8xf32>
    %118 = tpu.matmul %116, %117, %cst_48 {dimension_numbers = #tpu.dot_dimension_numbers<[1], [1], [0], [0], [0, 0, 1, 0], [], []>} : vector<8x8xbf16>, vector<8x8xbf16>, vector<8x8xf32> -> vector<8x8xf32>
    %119 = arith.addf %118, %15 : vector<8x8xf32>
    %cst_49 = arith.constant 0.000000e+00 : f32
    %120 = vector.broadcast %cst_49 : f32 to vector<8x8xf32>
    %c1_50 = arith.constant 1 : index
    %c2_51 = arith.constant 2 : index
    %121 = memref.load %arg9[%c1_50, %c2_51] : memref<5x4xf32, #tpu.memory_space<smem>>
    %cst_52 = arith.constant 0.000000e+00 : f32
    %122 = vector.broadcast %121 : f32 to vector<8x8xf32>
    %123 = vector.broadcast %cst_52 : f32 to vector<8x8xf32>
    %124 = arith.select %20, %122, %123 : vector<8x8xi1>, vector<8x8xf32>
    %125 = arith.addf %120, %124 : vector<8x8xf32>
    %c2_53 = arith.constant 2 : index
    %c2_54 = arith.constant 2 : index
    %126 = memref.load %arg9[%c2_53, %c2_54] : memref<5x4xf32, #tpu.memory_space<smem>>
    %cst_55 = arith.constant 0.000000e+00 : f32
    %127 = vector.broadcast %126 : f32 to vector<8x8xf32>
    %128 = vector.broadcast %cst_55 : f32 to vector<8x8xf32>
    %129 = arith.select %22, %127, %128 : vector<8x8xi1>, vector<8x8xf32>
    %130 = arith.addf %125, %129 : vector<8x8xf32>
    %c3_56 = arith.constant 3 : index
    %c2_57 = arith.constant 2 : index
    %131 = memref.load %arg9[%c3_56, %c2_57] : memref<5x4xf32, #tpu.memory_space<smem>>
    %cst_58 = arith.constant 0.000000e+00 : f32
    %132 = vector.broadcast %131 : f32 to vector<8x8xf32>
    %133 = vector.broadcast %cst_58 : f32 to vector<8x8xf32>
    %134 = arith.select %24, %132, %133 : vector<8x8xi1>, vector<8x8xf32>
    %135 = arith.addf %130, %134 : vector<8x8xf32>
    %c4_59 = arith.constant 4 : index
    %c2_60 = arith.constant 2 : index
    %136 = memref.load %arg9[%c4_59, %c2_60] : memref<5x4xf32, #tpu.memory_space<smem>>
    %cst_61 = arith.constant 0.000000e+00 : f32
    %137 = vector.broadcast %136 : f32 to vector<8x8xf32>
    %138 = vector.broadcast %cst_61 : f32 to vector<8x8xf32>
    %139 = arith.select %26, %137, %138 : vector<8x8xi1>, vector<8x8xf32>
    %140 = arith.addf %135, %139 : vector<8x8xf32>
    %141 = arith.addf %119, %140 : vector<8x8xf32>
    %cst_62 = arith.constant dense<0xFF800000> : vector<8xf32>
    %142 = vector.multi_reduction <maximumf>, %141, %cst_62 [1] : vector<8x8xf32> to vector<8xf32>
    %143 = vector.shape_cast %142 : vector<8xf32> to vector<8x1xf32>
    %144 = vector.broadcast %143 : vector<8x1xf32> to vector<8x8xf32>
    %145 = arith.subf %141, %144 : vector<8x8xf32>
    %146 = math.exp %145 : vector<8x8xf32>
    %cst_63 = arith.constant dense<0.000000e+00> : vector<8xf32>
    %147 = vector.multi_reduction <add>, %146, %cst_63 [1] : vector<8x8xf32> to vector<8xf32>
    %148 = vector.shape_cast %147 : vector<8xf32> to vector<8x1xf32>
    %149 = tpu.reciprocal %148 {approx = true} : vector<8x1xf32> -> vector<8x1xf32>
    %150 = vector.broadcast %149 : vector<8x1xf32> to vector<8x8xf32>
    %151 = arith.mulf %146, %150 : vector<8x8xf32>
    %152 = arith.truncf %151 : vector<8x8xf32> to vector<8x8xbf16>
    %153 = arith.truncf %115 : vector<8x8xf32> to vector<8x8xbf16>
    %cst_64 = arith.constant dense<0.000000e+00> : vector<8x8xf32>
    %154 = tpu.matmul %152, %153, %cst_64 {dimension_numbers = #tpu.dot_dimension_numbers<[1], [0], [0], [1], [0, 0, 1, 1], [], []>} : vector<8x8xbf16>, vector<8x8xbf16>, vector<8x8xf32> -> vector<8x8xf32>
    %c0_65 = arith.constant 0 : index
    %c16 = arith.constant 16 : index
    %155 = vector.load %arg11[%c0_65, %c16] : memref<8x32xf32, #tpu.memory_space<vmem>>, vector<8x8xf32>
    tpu.vector_store %arg11[%c0_65, %c16], %154 {strides = array<i32>} : memref<8x32xf32, #tpu.memory_space<vmem>>, vector<8x8xf32>,
    %156 = vector.extract_strided_slice %6 {offsets = [0, 24], sizes = [8, 8], strides = [1, 1]} : vector<8x96xf32> to vector<8x8xf32>
    %157 = vector.extract_strided_slice %6 {offsets = [0, 56], sizes = [8, 8], strides = [1, 1]} : vector<8x96xf32> to vector<8x8xf32>
    %158 = vector.extract_strided_slice %6 {offsets = [0, 88], sizes = [8, 8], strides = [1, 1]} : vector<8x96xf32> to vector<8x8xf32>
    %159 = arith.truncf %156 : vector<8x8xf32> to vector<8x8xbf16>
    %160 = arith.truncf %157 : vector<8x8xf32> to vector<8x8xbf16>
    %cst_66 = arith.constant dense<0.000000e+00> : vector<8x8xf32>
    %161 = tpu.matmul %159, %160, %cst_66 {dimension_numbers = #tpu.dot_dimension_numbers<[1], [1], [0], [0], [0, 0, 1, 0], [], []>} : vector<8x8xbf16>, vector<8x8xbf16>, vector<8x8xf32> -> vector<8x8xf32>
    %162 = arith.addf %161, %15 : vector<8x8xf32>
    %cst_67 = arith.constant 0.000000e+00 : f32
    %163 = vector.broadcast %cst_67 : f32 to vector<8x8xf32>
    %c1_68 = arith.constant 1 : index
    %c3_69 = arith.constant 3 : index
    %164 = memref.load %arg9[%c1_68, %c3_69] : memref<5x4xf32, #tpu.memory_space<smem>>
    %cst_70 = arith.constant 0.000000e+00 : f32
    %165 = vector.broadcast %164 : f32 to vector<8x8xf32>
    %166 = vector.broadcast %cst_70 : f32 to vector<8x8xf32>
    %167 = arith.select %20, %165, %166 : vector<8x8xi1>, vector<8x8xf32>
    %168 = arith.addf %163, %167 : vector<8x8xf32>
    %c2_71 = arith.constant 2 : index
    %c3_72 = arith.constant 3 : index
    %169 = memref.load %arg9[%c2_71, %c3_72] : memref<5x4xf32, #tpu.memory_space<smem>>
    %cst_73 = arith.constant 0.000000e+00 : f32
    %170 = vector.broadcast %169 : f32 to vector<8x8xf32>
    %171 = vector.broadcast %cst_73 : f32 to vector<8x8xf32>
    %172 = arith.select %22, %170, %171 : vector<8x8xi1>, vector<8x8xf32>
    %173 = arith.addf %168, %172 : vector<8x8xf32>
    %c3_74 = arith.constant 3 : index
    %c3_75 = arith.constant 3 : index
    %174 = memref.load %arg9[%c3_74, %c3_75] : memref<5x4xf32, #tpu.memory_space<smem>>
    %cst_76 = arith.constant 0.000000e+00 : f32
    %175 = vector.broadcast %174 : f32 to vector<8x8xf32>
    %176 = vector.broadcast %cst_76 : f32 to vector<8x8xf32>
    %177 = arith.select %24, %175, %176 : vector<8x8xi1>, vector<8x8xf32>
    %178 = arith.addf %173, %177 : vector<8x8xf32>
    %c4_77 = arith.constant 4 : index
    %c3_78 = arith.constant 3 : index
    %179 = memref.load %arg9[%c4_77, %c3_78] : memref<5x4xf32, #tpu.memory_space<smem>>
    %cst_79 = arith.constant 0.000000e+00 : f32
    %180 = vector.broadcast %179 : f32 to vector<8x8xf32>
    %181 = vector.broadcast %cst_79 : f32 to vector<8x8xf32>
    %182 = arith.select %26, %180, %181 : vector<8x8xi1>, vector<8x8xf32>
    %183 = arith.addf %178, %182 : vector<8x8xf32>
    %184 = arith.addf %162, %183 : vector<8x8xf32>
    %cst_80 = arith.constant dense<0xFF800000> : vector<8xf32>
    %185 = vector.multi_reduction <maximumf>, %184, %cst_80 [1] : vector<8x8xf32> to vector<8xf32>
    %186 = vector.shape_cast %185 : vector<8xf32> to vector<8x1xf32>
    %187 = vector.broadcast %186 : vector<8x1xf32> to vector<8x8xf32>
    %188 = arith.subf %184, %187 : vector<8x8xf32>
    %189 = math.exp %188 : vector<8x8xf32>
    %cst_81 = arith.constant dense<0.000000e+00> : vector<8xf32>
    %190 = vector.multi_reduction <add>, %189, %cst_81 [1] : vector<8x8xf32> to vector<8xf32>
    %191 = vector.shape_cast %190 : vector<8xf32> to vector<8x1xf32>
    %192 = tpu.reciprocal %191 {approx = true} : vector<8x1xf32> -> vector<8x1xf32>
    %193 = vector.broadcast %192 : vector<8x1xf32> to vector<8x8xf32>
    %194 = arith.mulf %189, %193 : vector<8x8xf32>
    %195 = arith.truncf %194 : vector<8x8xf32> to vector<8x8xbf16>
    %196 = arith.truncf %158 : vector<8x8xf32> to vector<8x8xbf16>
    %cst_82 = arith.constant dense<0.000000e+00> : vector<8x8xf32>
    %197 = tpu.matmul %195, %196, %cst_82 {dimension_numbers = #tpu.dot_dimension_numbers<[1], [0], [0], [1], [0, 0, 1, 1], [], []>} : vector<8x8xbf16>, vector<8x8xbf16>, vector<8x8xf32> -> vector<8x8xf32>
    %c0_83 = arith.constant 0 : index
    %c24 = arith.constant 24 : index
    %198 = vector.load %arg11[%c0_83, %c24] : memref<8x32xf32, #tpu.memory_space<vmem>>, vector<8x8xf32>
    tpu.vector_store %arg11[%c0_83, %c24], %197 {strides = array<i32>} : memref<8x32xf32, #tpu.memory_space<vmem>>, vector<8x8xf32>,
    %c0_84 = arith.constant 0 : index
    %c0_85 = arith.constant 0 : index
    %199 = vector.load %arg11[%c0_84, %c0_85] : memref<8x32xf32, #tpu.memory_space<vmem>>, vector<8x32xf32>
    %200 = arith.truncf %199 : vector<8x32xf32> to vector<8x32xbf16>
    %c0_86 = arith.constant 0 : index
    %c0_87 = arith.constant 0 : index
    %201 = vector.load %arg7[%c0_86, %c0_87] : memref<32x32xbf16, #tpu.memory_space<vmem>>, vector<32x32xbf16>
    %cst_88 = arith.constant dense<0.000000e+00> : vector<8x32xf32>
    %202 = tpu.matmul %200, %201, %cst_88 {dimension_numbers = #tpu.dot_dimension_numbers<[1], [0], [0], [1], [0, 0, 1, 1], [], []>} : vector<8x32xbf16>, vector<32x32xbf16>, vector<8x32xf32> -> vector<8x32xf32>
    %c0_89 = arith.constant 0 : index
    %c0_90 = arith.constant 0 : index
    %203 = vector.load %arg8[%c0_89, %c0_90] : memref<1x32xf32, #tpu.memory_space<vmem>>, vector<1x32xf32>
    %204 = vector.broadcast %203 : vector<1x32xf32> to vector<8x32xf32>
    %205 = arith.addf %202, %204 : vector<8x32xf32>
    %c0_91 = arith.constant 0 : index
    %c0_92 = arith.constant 0 : index
    %c0_93 = arith.constant 0 : index
    %206 = vector.load %arg10[%c0_91, %c0_92, %c0_93] : memref<1x8x32xf32, #tpu.memory_space<vmem>>, vector<1x8x32xf32>
    %207 = vector.shape_cast %206 : vector<1x8x32xf32> to vector<8x32xf32>
    %208 = vector.shape_cast %205 : vector<8x32xf32> to vector<1x8x32xf32>
    tpu.vector_store %arg10[%c0_91, %c0_92, %c0_93], %208 {strides = array<i32>} : memref<1x8x32xf32, #tpu.memory_space<vmem>>, vector<1x8x32xf32>,
    return
  }
  func.func @transform_0(%arg0: i32) -> (i32, i32, i32) {
    %c0_i32 = arith.constant 0 : i32
    %c0_i32_0 = arith.constant 0 : i32
    %c0_i32_1 = arith.constant 0 : i32
    return %arg0, %c0_i32, %c0_i32_0 : i32, i32, i32
  }
  func.func @transform_1(%arg0: i32) -> (i32, i32, i32) {
    %c0_i32 = arith.constant 0 : i32
    %c0_i32_0 = arith.constant 0 : i32
    %c0_i32_1 = arith.constant 0 : i32
    return %arg0, %c0_i32, %c0_i32_0 : i32, i32, i32
  }
  func.func @transform_2(%arg0: i32) -> (i32, i32) {
    %c0_i32 = arith.constant 0 : i32
    %c0_i32_0 = arith.constant 0 : i32
    %c0_i32_1 = arith.constant 0 : i32
    return %c0_i32, %c0_i32_0 : i32, i32
  }
  func.func @transform_3(%arg0: i32) -> (i32, i32, i32) {
    %c0_i32 = arith.constant 0 : i32
    %c0_i32_0 = arith.constant 0 : i32
    %c0_i32_1 = arith.constant 0 : i32
    return %arg0, %c0_i32, %c0_i32_0 : i32, i32, i32
  }
  func.func @transform_4(%arg0: i32) -> (i32, i32) {
    %c0_i32 = arith.constant 0 : i32
    %c0_i32_0 = arith.constant 0 : i32
    %c0_i32_1 = arith.constant 0 : i32
    return %c0_i32, %c0_i32_0 : i32, i32
  }
  func.func @transform_5(%arg0: i32) -> (i32, i32) {
    %c0_i32 = arith.constant 0 : i32
    %c0_i32_0 = arith.constant 0 : i32
    %c0_i32_1 = arith.constant 0 : i32
    return %c0_i32, %c0_i32_0 : i32, i32
  }
  func.func @transform_6(%arg0: i32) -> (i32, i32) {
    %c0_i32 = arith.constant 0 : i32
    %c0_i32_0 = arith.constant 0 : i32
    %c0_i32_1 = arith.constant 0 : i32
    return %c0_i32, %c0_i32_0 : i32, i32
  }
  func.func @transform_7(%arg0: i32) -> (i32, i32) {
    %c0_i32 = arith.constant 0 : i32
    %c0_i32_0 = arith.constant 0 : i32
    %c0_i32_1 = arith.constant 0 : i32
    return %c0_i32, %c0_i32_0 : i32, i32
  }
  func.func @transform_8(%arg0: i32) -> (i32, i32) {
    %c0_i32 = arith.constant 0 : i32
    %c0_i32_0 = arith.constant 0 : i32
    %c0_i32_1 = arith.constant 0 : i32
    return %c0_i32, %c0_i32_0 : i32, i32
  }
  func.func @transform_9(%arg0: i32) -> (i32, i32, i32) {
    %c0_i32 = arith.constant 0 : i32
    %c0_i32_0 = arith.constant 0 : i32
    %c0_i32_1 = arith.constant 0 : i32
    return %arg0, %c0_i32, %c0_i32_0 : i32, i32, i32
  }
}

</mosaic_0001>

<bundles_post_ra>
// kernel: tpu_custom_call.1
= control target key start
LH: loop header
LB: loop body
LE: loop exit
PB: predicated region body
PF: predicated region fallthrough
CT: control target
= control target key end

     0   :  { %s2338_s0 = inlined_call_operand.hbm [shape: bf16[2,8,32], index: 0, kind: input, shape index: {}]   ;;  %s2339_s1 = inlined_call_operand.hbm [shape: s8[2,8,8], index: 1, kind: input, shape index: {}]   ;;  %s2340_s2 = inlined_call_operand.hbm [shape: f32[8,8], index: 2, kind: input, shape index: {}]   ;;  %s2341_s3 = inlined_call_operand.vmem [shape: s32[2,1,8], index: 3, kind: input, shape index: {}]   ;;  %s2342_s4 = inlined_call_operand.vmem [shape: bf16[32,96], index: 4, kind: input, shape index: {}]   ;;  %s2343_s5 = inlined_call_operand.hbm [shape: f32[1,96], index: 5, kind: input, shape index: {}]   ;;  %s2344_s6 = inlined_call_operand.vmem [shape: bf16[32,32], index: 6, kind: input, shape index: {}]   ;;  %s2345_s7 = inlined_call_operand.hbm [shape: f32[1,32], index: 7, kind: input, shape index: {}]   ;;  %s2346_s8 = inlined_call_operand.vmem [shape: f32[5,4], index: 8, kind: input, shape index: {}]   ;;  %s2347_s9 = inlined_call_operand.hbm [shape: f32[2,8,32], index: 9, kind: output, shape index: {}]  }
   0x1   :  { %2352 = sst [smem:[#allocation21_spill]] %s2338_s0 }
   0x2   :  { %2353 = sst [smem:[#allocation22_spill]] %s2340_s2 }
   0x3   :  { %2354 = sst [smem:[#allocation23_spill]] %s2343_s5 }
   0x4   :  { %2355 = sst [smem:[#allocation24_spill]] %s2345_s7 }
   0x5   :  { %2356 = sst [smem:[#allocation25_spill]] %s2346_s8 }
   0x6   :  { %14 = vsyncpa [#allocation4], 0 }
   0x7   :  { %16 = vsyncpa [#allocation4 + $0x1], 0 }
   0x8   :  { %17 = vsyncpa [#allocation8], 0 }
   0x9   :  { %19 = vsyncpa [#allocation8 + $0x1], 0 }
   0xa   :  { %20 = vsyncpa [#allocation11], 0 }
   0xb   :  { %21 = vsyncpa [#allocation6], 0 }
   0xc   :  { %22 = vsyncpa [#allocation5], 0 }
   0xd   :  { %24 = vsyncpa [#allocation5 + $0x1], 0  ;;  %s1876_s30 = smov 0   ;;  %s1878_s10 = smov 0  }
   0xe   :  { %s1880_s11 = smov 0   ;;  %s1882_s12 = smov 0  }
   0xf LB: > { %s1802_s13 = smov [#allocation9]   ;;  %s1897_s15 = sadd.s32 4294967295, %s1800_s12   ;;  %s1800_s12 = sphi %s1882_s12, %s2385_s12   ;;  %s1796_s11 = sphi %s1880_s11, %s2384_s11   ;;  %s1792_s10 = sphi %s1878_s10, %s2383_s10   ;;  %s1788_s30 = sphi %s1876_s30, %s2382_s30  }
  0x10   : > { %s278_s14 = sshll.u32 %s1802_s13, 4  ;;  %p1290_p0 = scmp.ge.s32.totalorder %s1800_s12, 1  ;;  %s1902_s14 = int_to_ptr.vmem [resolvable:$true] %s278_s14 }
  0x11   : > { %p2348_p1 = scmp.eq.s32.totalorder %s1897_s15, 0  ;;  %p265_p2 = scmp.lt.s32.totalorder %s1800_s12, 3 }
  0x12   : > { %s1803_s17 = smov [#allocation10]   ;;  %s1804_s19 = smov [#allocation12]  }
  0x13   : > { %p1904_p3 = pnand %p1290_p0, %p265_p2  ;;  %s292_s18 = sshll.u32 %s1803_s17, 4  ;;  %s1911_s18 = int_to_ptr.vmem [resolvable:$true] %s292_s18 }
  0x14   : > { %s306_s20 = sshll.u32 %s1804_s19, 4  ;;  %s2359_s8 = sld [smem:[#allocation25_spill]]  ;;  %s1919_s20 = int_to_ptr.vmem [resolvable:$true] %s306_s20 }
  0x15   : > { %s2357_s16 = scalar_select %p1904_p3, 1, 0 }
  0x16   : > { %p1452_p5 = pneg %p1904_p3  ;;  %s2360_s2 = sld [smem:[#allocation22_spill]] }
  0x18   : > { %p1915_p6 = pnand %p1452_p5, %p2348_p1 }
  0x1a   : > { %s317_s24 = sshll.u32 %s2359_s8, 4  ;;  %p1934_p8 = pneg %p1915_p6  ;;  %s1924_s24 = int_to_ptr.vmem [resolvable:$true] %s317_s24 }
  0x1c   : > { %s1559_s27 = scalar_lea.hbm %s2360_s2, 128 }
  0x1d   : > { %p1560_p7 = scmp.ne.s32.totalorder %s2360_s2, %s1559_s27  ;;  %p1566_p11 = scmp.lt.u32.totalorder %s1559_s27, %s2360_s2 }
  0x1f   : > { %p1562_p9 = pnand %p1934_p8, %p1560_p7 }
  0x21   : > { %p1563_p10 = pneg %p1562_p9 }
  0x23   : > { %p1568_p12 = pnand %p1566_p11, %p1563_p10 }
  0x25   : > { %1571 = shalt.err (!%p1568_p12)
}
  0x26   : > { %s1572_s22 = scalar_lea.vmem %s1902_s14, 128  ;;  %p1580_p5 = scmp.lt.s32.totalorder %s1902_s14, %s1902_s14 }
  0x27   : > { %p1573_p13 = scmp.ne.s32.totalorder %s1902_s14, %s1572_s22  ;;  %p1581_p4 = scmp.lt.s32.totalorder %s1572_s22, %s1572_s22 }
  0x29   : > { %p1575_p0 = pnand %p1573_p13, %p1934_p8  ;;  %p1582_p7 = por %p1581_p4, %p1580_p5 }
  0x2b   : > { %p1576_p2 = pneg %p1575_p0 }
  0x2d   : > { %p1583_p9 = pnand %p1582_p7, %p1576_p2 }
  0x2f   : > { %1586 = shalt.err (!%p1583_p9)
}
  0x30   : > { %1455 = dma.hbm_to_vmem [thread:$0]  (!%p1915_p6), %s2360_s2, 128, %s1902_s14, [#allocation8]  }
  0x31   : > { %s2362_s5 = sld [smem:[#allocation23_spill]] }
  0x37   : > { %s1587_s28 = scalar_lea.hbm %s2362_s5, 16 }
  0x38   : > { %p1588_p10 = scmp.ne.s32.totalorder %s2362_s5, %s1587_s28  ;;  %p1594_p12 = scmp.lt.u32.totalorder %s1587_s28, %s2362_s5 }
  0x3a   : > { %p1590_p4 = pnand %p1588_p10, %p1934_p8 }
  0x3c   : > { %p1591_p11 = pneg %p1590_p4 }
  0x3e   : > { %p1596_p13 = pnand %p1594_p12, %p1591_p11 }
  0x40   : > { %1599 = shalt.err (!%p1596_p13)
}
  0x41   : > { %s1600_s14 = scalar_lea.vmem %s1911_s18, 16  ;;  %s1607_s23 = scalar_lea.vmem %s1911_s18, 32 }
  0x42   : > { %p1601_p0 = scmp.ne.s32.totalorder %s1911_s18, %s1600_s14  ;;  %p1608_p7 = scmp.lt.s32.totalorder %s1911_s18, %s1911_s18 }
  0x43   : > { %p1609_p9 = scmp.lt.s32.totalorder %s1607_s23, %s1600_s14 }
  0x44   : > { %p1603_p2 = pnand %p1601_p0, %p1934_p8 }
  0x45   : > { %p1610_p10 = por %p1609_p9, %p1608_p7 }
  0x46   : > { %p1604_p5 = pneg %p1603_p2 }
  0x48   : > { %p1611_p4 = pnand %p1610_p10, %p1604_p5 }
  0x4a   : > { %1614 = shalt.err (!%p1611_p4)
}
  0x4b   : > { %1458 = dma.hbm_to_vmem [thread:$0]  (!%p1915_p6), %s2362_s5, 16, %s1911_s18, [#allocation11]  }
  0x4c   : > { %s2363_s7 = sld [smem:[#allocation24_spill]] }
  0x52   : > { %s1615_s29 = scalar_lea.hbm %s2363_s7, 16 }
  0x53   : > { %p1616_p11 = scmp.ne.s32.totalorder %s2363_s7, %s1615_s29  ;;  %p1622_p0 = scmp.lt.u32.totalorder %s1615_s29, %s2363_s7 }
  0x55   : > { %p1618_p12 = pnand %p1616_p11, %p1934_p8 }
  0x57   : > { %p1619_p13 = pneg %p1618_p12 }
  0x59   : > { %p1624_p2 = pnand %p1622_p0, %p1619_p13 }
  0x5b   : > { %1627 = shalt.err (!%p1624_p2)
}
  0x5c   : > { %s1628_s18 = scalar_lea.vmem %s1919_s20, 16  ;;  %s1635_s23 = scalar_lea.vmem %s1919_s20, 32 }
  0x5d   : > { %p1629_p5 = scmp.ne.s32.totalorder %s1919_s20, %s1628_s18  ;;  %p1636_p10 = scmp.lt.s32.totalorder %s1919_s20, %s1919_s20 }
  0x5e   : > { %p1637_p4 = scmp.lt.s32.totalorder %s1635_s23, %s1628_s18 }
  0x5f   : > { %p1631_p7 = pnand %p1629_p5, %p1934_p8 }
  0x60   : > { %p1638_p11 = por %p1637_p4, %p1636_p10 }
  0x61   : > { %p1632_p9 = pneg %p1631_p7 }
  0x63   : > { %p1639_p12 = pnand %p1638_p11, %p1632_p9 }
  0x65   : > { %1642 = shalt.err (!%p1639_p12)
}
  0x66   : > { %1461 = dma.hbm_to_vmem [thread:$0]  (!%p1915_p6), %s2363_s7, 16, %s1919_s20, [#allocation11]  }
  0x67   : > { %s1643_s27 = scalar_lea.vmem %s1924_s24, 128  ;;  %p1651_p5 = scmp.lt.s32.totalorder %s1924_s24, %s1924_s24 }
  0x68   : > { %p1644_p13 = scmp.ne.s32.totalorder %s1924_s24, %s1643_s27  ;;  %p1652_p7 = scmp.lt.s32.totalorder %s1643_s27, %s1643_s27 }
  0x6a   : > { %p1646_p0 = pnand %p1644_p13, %p1934_p8  ;;  %p1653_p9 = por %p1652_p7, %p1651_p5 }
  0x6c   : > { %p1647_p2 = pneg %p1646_p0 }
  0x6e   : > { %p1654_p10 = pnand %p1653_p9, %p1647_p2 }
  0x70   : > { %1657 = shalt.err (!%p1654_p10)
}
  0x71   : > { %s1805_s28 = smov [#allocation13]   ;;  %s1289_s20 = sadd.s32 4294967294, %s1800_s12  }
  0x72   : > { %1464 = dma.vmem_to_smem (!%p1915_p6), %s1924_s24, 128, %s1805_s28, [#allocation6]  }
  0x73   : > { %s2014_s13 = sadd.s32 1, %s1800_s12   ;;  %s37_s29 = sadd.s32 1, %s1796_s11 }
  0x74   : > { %s34_s21 = ssub.s32 %s1800_s12, %s2014_s13  ;;  %p44_p4 = scmp.ne.s32.totalorder %s1796_s11, %s1792_s10 }
  0x75   : > { %p35_p8 = scmp.eq.s32.totalorder %s34_s21, 0  ;;  %p45_p11 = scmp.eq.s32.totalorder %s1800_s12, 0 }
  0x76   : > { %p50_p12 = scmp.ne.s32.totalorder %s1792_s10, %s1788_s30  ;;  %p252_p0 = scmp.eq.s32.totalorder %s1897_s15, 1 }
  0x77   : > { %s2025_s17 = scalar_select %p35_p8, %s1796_s11, %s37_s29  }
  0x78   : > { %p2027_p13 = por %p45_p11, %p44_p4  ;;  %p2033_p6 = por %p2348_p1, %p50_p12 }
  0x79   : > { %p258_p2 = scmp.eq.s32.totalorder %s1289_s20, 1  ;;  %p1480_p5 = scmp.lt.s32.totalorder %s1800_s12, 2 }
  0x7a   : > { %s2365_s24 = scalar_select %p2033_p6, 1, 0 }
  0x7b   : > { %s2040_s22 = sand.u32 1, %s1796_s11   ;;  %p2042_p7 = por %p252_p0, %p44_p4 }
  0x7c   : > { %p2046_p9 = por %p258_p2, %p50_p12  ;;  %s1296_s23 = sshll.u32 %s2040_s22, 2 }
  0x7d   : > { %s2366_s14 = scalar_select %p2042_p7, 1, 0 }
  0x7e   : > { %s2367_s18 = scalar_select %p2046_p9, 1, 0 }
  0x7f   : > { %s1297_s25 = sshll.u32 %s1800_s12, 6  ;;  %s2368_s0 = sld [smem:[#allocation21_spill]] }
  0x80   : > { %s332_s20 = scalar_lea.vmem [#allocation3], %s1296_s23  ;;  %p2061_p10 = pnand %p1480_p5, %p2027_p13 }
  0x81   : > { %s339_s21 = sshll.u32 %s332_s20, 4  ;;  %s1298_s5 = sshll.u32 %s2040_s22, 1  ;;  %s2057_s21 = int_to_ptr.vmem [resolvable:$true] %s339_s21 }
  0x82   : > { %s329_s26 = scalar_lea.sflag [#allocation4], %s2040_s22  ;;  %p1660_p4 = pneg %p2061_p10 }
  0x85   : > { %s2055_s28 = scalar_lea.hbm %s2368_s0, %s1297_s25  ;;  %s1663_s19 = scalar_lea.hbm %s2368_s0, 128 }
  0x86   : > { %s1658_s25 = scalar_lea.hbm %s2055_s28, 64  ;;  %p1664_p13 = scmp.lt.u32.totalorder %s2055_s28, %s2368_s0 }
  0x87   : > { %p1659_p8 = scmp.ne.s32.totalorder %s2055_s28, %s1658_s25  ;;  %p1665_p0 = scmp.lt.u32.totalorder %s1663_s19, %s1658_s25 }
  0x88   : > { %p1667_p5 = scmp.lt.u32.totalorder %s1658_s25, %s2055_s28 }
  0x89   : > { %p1661_p11 = pnand %p1660_p4, %p1659_p8  ;;  %p1666_p2 = por %p1665_p0, %p1664_p13 }
  0x8b   : > { %p1662_p12 = pneg %p1661_p11  ;;  %p1668_p1 = por %p1667_p5, %p1666_p2 }
  0x8d   : > { %p1669_p9 = pnand %p1668_p1, %p1662_p12 }
  0x8f   : > { %1672 = shalt.err (!%p1669_p9)
}
  0x90   : > { %s1673_s2 = scalar_lea.vmem %s2057_s21, 64  ;;  %s1806_s23 = smov [#allocation3]  }
  0x91   : > { %p1674_p8 = scmp.ne.s32.totalorder %s2057_s21, %s1673_s2  ;;  %s1678_s27 = sshll.u32 %s1806_s23, 4  ;;  %s1679_s27 = int_to_ptr.vmem [resolvable:$false] %s1678_s27 }
  0x92   : > { %s1680_s7 = scalar_lea.vmem %s1679_s27, 128  ;;  %p1681_p6 = scmp.lt.s32.totalorder %s2057_s21, %s1679_s27 }
  0x93   : > { %p1676_p11 = pnand %p1674_p8, %p1660_p4  ;;  %p1682_p13 = scmp.lt.s32.totalorder %s1680_s7, %s1673_s2 }
  0x95   : > { %p1677_p7 = pneg %p1676_p11  ;;  %p1683_p0 = por %p1682_p13, %p1681_p6 }
  0x97   : > { %p1684_p2 = pnand %p1683_p0, %p1677_p7 }
  0x99   : > { %1687 = shalt.err (!%p1684_p2)
}
  0x9a   : > { %1468 = dma.hbm_to_vmem [thread:$0]  (!%p2061_p10), %s2055_s28, 64, %s2057_s21, %s329_s26  }
  0x9b   : > { %s1299_s25 = sshll.u32 %s1800_s12, 5  ;;  %s350_s2 = scalar_lea.vmem [#allocation7], %s1298_s5 }
  0x9c   : > { %s2097_s23 = scalar_lea.hbm %s2339_s1, %s1299_s25  ;;  %s357_s27 = sshll.u32 %s350_s2, 4  ;;  %s358_s27 = int_to_ptr.vmem [resolvable:$true] %s357_s27 }
  0x9d   : > { %s2370_s7 = sand.u32 1, %s1800_s12   ;;  %s1688_s8 = scalar_lea.hbm %s2097_s23, 32 }
  0x9e   : > { %s347_s0 = scalar_lea.sflag [#allocation8], %s2370_s7  ;;  %p1689_p1 = scmp.ne.s32.totalorder %s2097_s23, %s1688_s8 }
  0x9f   : > { %s1693_s26 = scalar_lea.hbm %s2339_s1, 64  ;;  %p1694_p9 = scmp.lt.u32.totalorder %s2097_s23, %s2339_s1 }
  0xa0   : > { %p1691_p6 = pnand %p1689_p1, %p1660_p4  ;;  %p1695_p12 = scmp.lt.u32.totalorder %s1693_s26, %s1688_s8 }
  0xa1   : > { %p1697_p8 = scmp.lt.u32.totalorder %s1688_s8, %s2097_s23 }
  0xa2   : > { %p1692_p7 = pneg %p1691_p6  ;;  %p1696_p5 = por %p1695_p12, %p1694_p9 }
  0xa4   : > { %p1698_p11 = por %p1697_p8, %p1696_p5 }
  0xa6   : > { %p1699_p13 = pnand %p1698_p11, %p1692_p7 }
  0xa8   : > { %1702 = shalt.err (!%p1699_p13)
}
  0xa9   : > { %s1703_s5 = scalar_lea.vmem %s358_s27, 32  ;;  %s1807_s19 = smov [#allocation7]  }
  0xaa   : > { %p1704_p0 = scmp.ne.s32.totalorder %s358_s27, %s1703_s5  ;;  %s1708_s20 = sshll.u32 %s1807_s19, 4  ;;  %s1709_s20 = int_to_ptr.vmem [resolvable:$false] %s1708_s20 }
  0xab   : > { %s1710_s2 = scalar_lea.vmem %s1709_s20, 64  ;;  %p1711_p6 = scmp.lt.s32.totalorder %s358_s27, %s1709_s20 }
  0xac   : > { %p1706_p2 = pnand %p1704_p0, %p1660_p4  ;;  %p1712_p3 = scmp.lt.s32.totalorder %s1710_s2, %s1703_s5 }
  0xae   : > { %p1707_p1 = pneg %p1706_p2  ;;  %p1713_p9 = por %p1712_p3, %p1711_p6 }
  0xb0   : > { %p1714_p12 = pnand %p1713_p9, %p1707_p1 }
  0xb2   : > { %1717 = shalt.err (!%p1714_p12)
}
  0xb3   : > { %1471 = dma.hbm_to_vmem [thread:$0]  (!%p2061_p10), %s2097_s23, 32, %s358_s27, %s347_s0  }
  0xb4   : > { %p2371_p7 = scmp.ne.s32.totalorder %s2357_s16, 0 }
  0xb5   : > { %s2125_s8 = sand.u32 (!%p2371_p7), 1, %s1792_s10   ;;  %p2372_p4 = scmp.ne.s32.totalorder (!%p2371_p7), %s2365_s24, 0 }
  0xb6   : > { %372 = sbr.rel (%p2371_p7) target bundleno = 1712 (0x6b0), region = 56  ;;  %s1301_s7 = sshll.u32 (!%p2371_p7), %s2125_s8, 2 }
  0xb7   : > { %s375_s28 = scalar_lea.sflag (!%p2371_p7), [#allocation4], %s2125_s8  ;;  %s378_s21 = scalar_lea.vmem (!%p2371_p7), [#allocation3], %s1301_s7 }
  0xbd   : > { %1763 = dma.done.wait (%p2372_p4), %s375_s28, 64  }
  0xbe   : > { %1765 = vsyncadd (%p2372_p4), %s375_s28, 4294967232  ;;  %s383_s0 = sand.u32 1, %s1897_s15   ;;  %s1302_s16 = sshll.u32 %s2125_s8, 1 }
  0xbf   : > { %s384_s29 = scalar_lea.sflag [#allocation8], %s383_s0  ;;  %s2135_s23 = scalar_lea.vmem [#allocation7], %s1302_s16 }
  0xc0   : > { %1767 = dma.done.wait (%p2372_p4), %s384_s29, 32  }
  0xc1   : > { %1769 = vsyncadd (%p2372_p4), %s384_s29, 4294967264  ;;  %p2373_p3 = scmp.eq.s32.totalorder %s1897_s15, 0 }
  0xc3   : > { %1771 = dma.done.wait (%p2373_p3), [#allocation8], 128   ;;  %p2374_p10 = pmov %p2373_p3 }
  0xc4   : > { %p2375_p5 = pmov %p2373_p3 }
  0xc5   : > { %1773 = vsyncadd (%p2374_p10), [#allocation8], 4294967168 }
  0xc6   : > { %1775 = dma.done.wait (%p2375_p5), [#allocation11], 32   ;;  %p2376_p8 = pmov %p2373_p3 }
  0xc7   : > { %p2377_p11 = pmov %p2373_p3 }
  0xc8   : > { %1777 = vsyncadd (%p2376_p8), [#allocation11], 4294967264 }
  0xc9   : > { %1779 = dma.done.wait (%p2377_p11), [#allocation6], 128   ;;  %p2378_p13 = pmov %p2373_p3 }
  0xcb   : > { %1781 = vsyncadd (%p2378_p13), [#allocation6], 4294967168 }
  0xcc   : > { %408 = sfence }
  0xcd   : > { %v1539_v0 = vld [vmem:[%s2342_s4] sm:$0xff]   ;;  %v1808_v1 = vmov 0.0   ;;  %v1540_v2 = vld [vmem:[%s2342_s4 + $0x8] sm:$0xff]   ;;  %vm1809_vm0 = vmmov 0   ;;  %vm475_vm1 = vcmask 261120   ;;  %s1810_s25 = smov 120   ;;  %v523_v23 = vlaneseq }
  0xce   : > { %1366 = vmatprep.subr.bf16.mxu0 %v1808_v1  ;;  %1374 = vmatprep.subr.bf16.mxu1 %v1808_v1  ;;  %v451_v3 = vld [vmem:[%s378_s21] sm:$0xf]  ;;  %v1308_v4 = vld [vmem:[#allocation10] ss:$0 sm:$0xff]  ;;  %s1811_s5 = smov 96   ;;  %s1812_s19 = smov 80  }
  0xcf   : > { %1367 = vmatpush3.bf16.msra.mxu0 %v1539_v0  ;;  %1370 = vmatprep.mubr.msk.bf16.mxu0 %vm1809_vm0, %v1808_v1  ;;  %s1813_s20 = smov 88   ;;  %s1814_s2 = smov 72   ;;  %vm539_vm2 = vcmask 64512   ;;  %v529_v22 = vld [vmem:[%s2135_s23] sm:$0x3]  ;;  %v524_v26 = vshrl.u32 %v523_v23, 7 }
  0xd0   : > { %1368 = vmatprep.subr.bf16.mxu0 %v1808_v1  ;;  %1376 = vmatprep.mubr.msk.bf16.mxu1 %vm1809_vm0, %v1808_v1  ;;  %s1815_s7 = smov 112   ;;  %s1816_s28 = smov 104   ;;  %v2206_v25 = vunpack.c.0.s8 %v529_v22  ;;  %v1817_v30 = vmov 0   ;;  %v519_v41 = vld [vmem:[#allocation9] sm:$0xff]  ;;  %vm620_vm9 = vcmask 1043456   ;;  %vm796_vm10 = vcmask 130112  }
  0xd1   : > { %p447_p0 = scmp.lt.s32.totalorder %s1897_s15, 1  ;;  %s1313_s0 = sld [smem:[#allocation13 + $0x80]]  ;;  %v525_v29 = vsub.s32 0, %v524_v26  ;;  %vm929_vm11 = vcmask 195712   ;;  %vm1062_vm12 = vcmask 261312  }
  0xd2   : > { %s1314_s16 = sld [smem:[#allocation13 + $0x100]]  ;;  %vm531_vm4 = vcmp.eq.s32.totalorder %v2206_v25, 1  ;;  %vm532_vm5 = vcmp.eq.s32.totalorder %v2206_v25, 2  ;;  %vm533_vm6 = vcmp.eq.s32.totalorder %v2206_v25, 3  ;;  %s1321_s23 = sld [smem:[#allocation13 + $0x181]]  ;;  %vm534_vm7 = vcmp.eq.s32.totalorder %v2206_v25, 4 }
  0xd3   : > { %1369 = vmatpush3.bf16.msra.mxu0 %v1540_v2  ;;  %s448_s21 = scalar_select %p447_p0, %s1897_s15, 1 }
  0xd4   : > { %1380 = vmatprep.subr.bf16.mxu0 %v1808_v1  ;;  %s1315_s26 = sld [smem:[#allocation13 + $0x180]]  ;;  %s1334_s29 = sld [smem:[#allocation13 + $0x203]] }
  0xd5   : > { %s449_s27 = scalar_lea.vmem %s2341_s3, %s448_s21  ;;  %s1316_s22 = sld [smem:[#allocation13 + $0x200]] }
  0xd6   : > { %1371 = vmatmul.mubr.msk.bf16.vlgmr.msra.gmra.mrb[0].mxu0 %vm475_vm1, %v451_v3  ;;  %v520_v24 = vld [vmem:[%s449_s27] sm:$0x1]  ;;  %s1331_s21 = sld [smem:[#allocation13 + $0x83]]  ;;  %s1818_s24 = smov 56  }
  0xd7   : > { %1382 = vmatprep.mubr.msk.bf16.mxu0 %vm1809_vm0, %v1808_v1  ;;  %vm521_vm3 = vcmp.ne.s32.totalorder %v520_v24, 0  ;;  %v587_v27 = vstv %s1313_s0  ;;  %s1332_s0 = sld [smem:[#allocation13 + $0x103]]  ;;  %s1819_s27 = smov 64  }
  0xd8   : > { %v591_v28 = vstv %s1314_s16  ;;  %v522_v31 = vsel %vm521_vm3, 1, %v1817_v30  ;;  %v588_v32 = vsel %vm531_vm4, %v587_v27, 0.0  ;;  %v724_v46 = vstv %s1321_s23  ;;  %s1333_s16 = sld [smem:[#allocation13 + $0x183]]  ;;  %p2379_p1 = scmp.ne.s32.totalorder %s2366_s14, 0 }
  0xd9   : > { %v592_v33 = vsel %vm532_vm5, %v591_v28, 0.0  ;;  %v526_v35 = vrot.slane %v522_v31, %v525_v29  ;;  %v725_v51 = vsel %vm533_vm6, %v724_v46, 0.0 }
  0xda   : > { %v595_v34 = vstv %s1315_s26  ;;  %v593_v36 = vadd.f32 %v592_v33, %v588_v32  ;;  %v994_v29 = vstv %s1334_s29  ;;  %s1820_s26 = smov 40  }
  0xdb   : > { %v596_v37 = vsel %vm533_vm6, %v595_v34, 0.0  ;;  %v599_v38 = vstv %s1316_s22  ;;  %vm527_vm8 = vcmp.eq.s32.totalorder %v526_v35, 1  ;;  %v995_v34 = vsel %vm534_vm7, %v994_v29, 0.0  ;;  %s1821_s22 = smov 48  }
  0xdc   : > { %v597_v42 = vadd.f32 %v596_v37, %v593_v36  ;;  %v600_v43 = vsel %vm534_vm7, %v599_v38, 0.0  ;;  %v528_v47 = vsel %vm527_vm8, -inf, %v519_v41 }
  0xde   : > { %v601_v48 = vadd.f32 %v600_v43, %v597_v42 }
 0x1a9   : > { %v513_v5 = vpop.f32.mrb[0].mxu0 }
 0x1aa   : > { %v514_v6 = vadd.f32 %v1308_v4, %v513_v5  ;;  %v1372_v7 = vpop.f32.mrb[1].mxu0 }
 0x1ab   : > { %v516_v8 = vpop.f32.mrb[2].mxu0 }
 0x1ac   : > { %v2170_v9 = vpack.c.bf16 %v514_v6, %v514_v6  ;;  %v1373_v10 = vpop.f32.mrb[3].mxu0 }
 0x1ae   : > { %665 = vrot.lane.b32.xlu1 %v2170_v9, %s1810_s25  ;;  %537 = vrot.lane.b32.xlu0 %v2170_v9, %s1811_s5  ;;  %s1319_s25 = sld [smem:[#allocation13 + $0x81]] }
 0x1af   : > { %s1320_s5 = sld [smem:[#allocation13 + $0x101]] }
 0x1b2   : > { %800 = vrot.lane.b32.xlu1 %v2170_v9, %s1812_s19  ;;  %667 = vrot.lane.b32.xlu0 %v2170_v9, %s1813_s20  ;;  %s2217_s19 = sld [smem:[#allocation13 + $0x201]]  ;;  %s1325_s20 = sld [smem:[#allocation13 + $0x82]] }
 0x1b4   : > { %v716_v39 = vstv %s1319_s25  ;;  %s1822_s25 = smov 8  }
 0x1b5   : > { %v720_v40 = vstv %s1320_s5  ;;  %v717_v44 = vsel %vm531_vm4, %v716_v39, 0.0 }
 0x1b6   : > { %933 = vrot.lane.b32.xlu1 %v2170_v9, %s1814_s2  ;;  %798 = vrot.lane.b32.xlu0 %v2170_v9, %s1815_s7  ;;  %s1326_s2 = sld [smem:[#allocation13 + $0x102]]  ;;  %v721_v45 = vsel %vm532_vm5, %v720_v40, 0.0 }
 0x1b7   : > { %s1327_s7 = sld [smem:[#allocation13 + $0x182]]  ;;  %v722_v49 = vadd.f32 %v721_v45, %v717_v44 }
 0x1b8   : > { %v728_v54 = vstv %s2217_s19  ;;  %v849_v55 = vstv %s1325_s20 }
 0x1b9   : > { %v726_v60 = vadd.f32 %v725_v51, %v722_v49  ;;  %v729_v61 = vsel %vm534_vm7, %v728_v54, 0.0  ;;  %v850_v62 = vsel %vm531_vm4, %v849_v55, 0.0 }
 0x1ba   : > { %931 = vrot.lane.b32.xlu0 %v2170_v9, %s1816_s28  ;;  %s2228_s28 = sld [smem:[#allocation13 + $0x202]] }
 0x1bb   : > { %v730_v3 = vadd.f32 %v729_v61, %v726_v60 }
 0x1bc   : > { %v853_v56 = vstv %s1326_s2  ;;  %s1823_s2 = smov 16  }
 0x1bd   : > { %v854_v63 = vsel %vm532_vm5, %v853_v56, 0.0  ;;  %v857_v2 = vstv %s1327_s7  ;;  %s1824_s7 = smov 24  }
 0x1be   : > { %v855_v4 = vadd.f32 %v854_v63, %v850_v62  ;;  %v858_v6 = vsel %vm533_vm6, %v857_v2, 0.0 }
 0x1c0   : > { %v861_v10 = vstv %s2228_s28  ;;  %s1307_s28 = sshll.u32 %s2125_s8, 3 }
 0x220   : > { %v538_v11 = vpop.permute.xlu0 %537  ;;  %v666_v14 = vpop.permute.xlu1 %665 }
 0x221   : > { %v544_v12 = vsel %vm539_vm2, %v538_v11, 0  ;;  %v982_v11 = vstv %s1331_s21  ;;  %s1341_s21 = sshll.u32 %s1897_s15, 7  ;;  %s1134_s15 = scalar_lea.sflag [#allocation5], %s2125_s8 }
 0x222   : > { %1375 = vmatpush3.bf16.xpose.msra.mxu1 %v544_v12  ;;  %v986_v12 = vstv %s1332_s0  ;;  %s446_s0 = scalar_lea.vmem [#allocation14], %s1307_s28 }
 0x223   : > { %1386 = vmatprep.subr.bf16.mxu1 %v1808_v1 }
 0x224   : > { %v668_v13 = vpop.permute.xlu0 %667  ;;  %v801_v16 = vpop.permute.xlu1 %800 }
 0x225   : > { %v673_v15 = vsel %vm539_vm2, %v668_v13, 0  ;;  %v806_v17 = vsel %vm539_vm2, %v801_v16, 0  ;;  %v859_v16 = vadd.f32 %v858_v6, %v855_v4 }
 0x228   : > { %v934_v18 = vpop.permute.xlu1 %933  ;;  %v799_v19 = vpop.permute.xlu0 %798 }
 0x229   : > { %1377 = vmatmul.mubr.msk.bf16.vlgmr.msra.gmra.mrb[0].mxu1 %vm539_vm2, %v2170_v9  ;;  %v939_v20 = vsel %vm539_vm2, %v934_v18, 0  ;;  %v983_v18 = vsel %vm531_vm4, %v982_v11, 0.0 }
 0x22a   : > { %1387 = vmatpush3.bf16.xpose.msra.mxu1 %v673_v15  ;;  %1388 = vmatprep.mubr.msk.bf16.mxu1 %vm1809_vm0, %v1808_v1 }
 0x22b   : > { %1398 = vmatprep.subr.bf16.mxu1 %v1808_v1 }
 0x22c   : > { %v932_v21 = vpop.permute.xlu0 %931 }
 0x231   : > { %1389 = vmatmul.mubr.msk.bf16.vlgmr.msra.gmra.mrb[4].mxu1 %vm539_vm2, %v666_v14 }
 0x232   : > { %1399 = vmatpush3.bf16.xpose.msra.mxu1 %v806_v17  ;;  %1400 = vmatprep.mubr.msk.bf16.mxu1 %vm1809_vm0, %v1808_v1  ;;  %v862_v17 = vsel %vm534_vm7, %v861_v10, 0.0 }
 0x233   : > { %1410 = vmatprep.subr.bf16.mxu1 %v1808_v1  ;;  %v863_v22 = vadd.f32 %v862_v17, %v859_v16 }
 0x239   : > { %1401 = vmatmul.mubr.msk.bf16.vlgmr.msra.gmra.mrb[8].mxu1 %vm539_vm2, %v799_v19  ;;  %v987_v19 = vsel %vm532_vm5, %v986_v12, 0.0 }
 0x23a   : > { %1411 = vmatpush3.bf16.xpose.msra.mxu1 %v939_v20  ;;  %1412 = vmatprep.mubr.msk.bf16.mxu1 %vm1809_vm0, %v1808_v1  ;;  %v988_v23 = vadd.f32 %v987_v19, %v983_v18 }
 0x23b   : > { %1422 = vmatprep.subr.bf16.mxu1 %v1808_v1 }
 0x241   : > { %1413 = vmatmul.mubr.msk.bf16.vlgmr.msra.gmra.mrb[12].mxu1 %vm539_vm2, %v932_v21  ;;  %v990_v21 = vstv %s1333_s16  ;;  %s1147_s16 = sshll.u32 %s446_s0, 4  ;;  %s2295_s16 = int_to_ptr.vmem [resolvable:$true] %s1147_s16 }
 0x242   : > { %1426 = vmatprep.mubr.msk.bf16.mxu1 %vm1809_vm0, %v1808_v1  ;;  %v991_v26 = vsel %vm533_vm6, %v990_v21, 0.0 }
 0x243   : > { %v992_v33 = vadd.f32 %v991_v26, %v988_v23 }
 0x245   : > { %v996_v36 = vadd.f32 %v995_v34, %v992_v33  ;;  %v1541_v33 = vld [vmem:[%s2344_s6] sm:$0xff]   ;;  %v1542_v34 = vld [vmem:[%s2344_s6 + $0x8] sm:$0xff]  }
 0x246   : > { %1423 = vmatpush3.bf16.msra.mxu1 %v1541_v33 }
 0x247   : > { %1424 = vmatprep.subr.bf16.mxu1 %v1808_v1 }
 0x24a   : > { %1425 = vmatpush3.bf16.msra.mxu1 %v1542_v34 }
 0x2fc   : > { %v580_v50 = vpop.f32.mrb[0].mxu1 }
 0x2fd   : > { %v581_v52 = vadd.f32 %v580_v50, %v528_v47  ;;  %v1378_v53 = vpop.f32.mrb[1].mxu1 }
 0x2fe   : > { %v583_v57 = vpop.f32.mrb[2].mxu1 }
 0x2ff   : > { %v1379_v58 = vpop.f32.mrb[3].mxu1  ;;  %v602_v59 = vadd.f32 %v601_v48, %v581_v52 }
 0x301   : > { %v603_v0 = vsel %vm539_vm2, %v602_v59, -inf }
 0x302   : > { %604 = vmax.xlane.f32.xlu1 %v603_v0 }
 0x304   : > { %v709_v5 = vpop.f32.mrb[4].mxu1 }
 0x305   : > { %v710_v7 = vadd.f32 %v709_v5, %v528_v47  ;;  %v1390_v8 = vpop.f32.mrb[5].mxu1 }
 0x306   : > { %v712_v13 = vpop.f32.mrb[6].mxu1 }
 0x307   : > { %v1391_v14 = vpop.f32.mrb[7].mxu1  ;;  %v731_v15 = vadd.f32 %v730_v3, %v710_v7 }
 0x309   : > { %v732_v20 = vsel %vm539_vm2, %v731_v15, -inf }
 0x30a   : > { %733 = vmax.xlane.f32.xlu0 %v732_v20 }
 0x30c   : > { %v842_v24 = vpop.f32.mrb[8].mxu1 }
 0x30d   : > { %v843_v27 = vadd.f32 %v842_v24, %v528_v47  ;;  %v1402_v28 = vpop.f32.mrb[9].mxu1 }
 0x30e   : > { %v845_v30 = vpop.f32.mrb[10].mxu1 }
 0x30f   : > { %v1403_v31 = vpop.f32.mrb[11].mxu1  ;;  %v864_v32 = vadd.f32 %v863_v22, %v843_v27 }
 0x311   : > { %v865_v35 = vsel %vm539_vm2, %v864_v32, -inf }
 0x312   : > { %866 = vmax.xlane.f32.xlu0 %v865_v35 }
 0x314   : > { %v975_v37 = vpop.f32.mrb[12].mxu1 }
 0x315   : > { %v976_v38 = vadd.f32 %v975_v37, %v528_v47  ;;  %v1414_v39 = vpop.f32.mrb[13].mxu1 }
 0x316   : > { %v978_v40 = vpop.f32.mrb[14].mxu1 }
 0x317   : > { %v1415_v41 = vpop.f32.mrb[15].mxu1  ;;  %v997_v42 = vadd.f32 %v996_v36, %v976_v38 }
 0x319   : > { %v998_v43 = vsel %vm539_vm2, %v997_v42, -inf }
 0x31a   : > { %999 = vmax.xlane.f32.xlu1 %v998_v43 }
 0x38f   : > { %v605_v44 = vpop.xlane.xlu1 %604 }
 0x390   : > { %v606_v45 = vsub.f32 %v602_v59, %v605_v44 }
 0x392   : > { %v607_v46 = vmul.f32 1.442695, %v606_v45 }
 0x394   : > { %1543 = vpow2.f32 %v607_v46 }
 0x397   : > { %v734_v48 = vpop.xlane.xlu0 %733 }
 0x398   : > { %v735_v25 = vsub.f32 %v731_v15, %v734_v48  ;;  %v1336_v48 = vld [vmem:[#allocation12] ss:$0 sm:$0xff] }
 0x39a   : > { %v736_v49 = vmul.f32 1.442695, %v735_v25 }
 0x39c   : > { %1545 = vpow2.f32 %v736_v49 }
 0x39e   : > { %v1544_v50 = vpop.eup %1543 }
 0x39f   : > { %v867_v51 = vpop.xlane.xlu0 %866  ;;  %v609_v52 = vsel %vm539_vm2, %v1544_v50, 0.0 }
 0x3a0   : > { %v868_v47 = vsub.f32 %v864_v32, %v867_v51  ;;  %610 = vadd.xlane.f32.xlu0 %v609_v52 }
 0x3a2   : > { %v869_v53 = vmul.f32 1.442695, %v868_v47 }
 0x3a4   : > { %1547 = vpow2.f32 %v869_v53 }
 0x3a6   : > { %v1546_v54 = vpop.eup %1545 }
 0x3a7   : > { %v738_v55 = vsel %vm539_vm2, %v1546_v54, 0.0  ;;  %v1000_v58 = vpop.xlane.xlu1 %999 }
 0x3a8   : > { %739 = vadd.xlane.f32.xlu1 %v738_v55  ;;  %v1001_v59 = vsub.f32 %v997_v42, %v1000_v58 }
 0x3aa   : > { %v1002_v60 = vmul.f32 1.442695, %v1001_v59 }
 0x3ac   : > { %1549 = vpow2.f32 %v1002_v60 }
 0x3ae   : > { %v1548_v56 = vpop.eup %1547 }
 0x3af   : > { %v871_v57 = vsel %vm539_vm2, %v1548_v56, 0.0 }
 0x3b0   : > { %872 = vadd.xlane.f32.xlu0 %v871_v57 }
 0x3b6   : > { %v1550_v61 = vpop.eup %1549 }
 0x3b7   : > { %v1004_v62 = vsel %vm539_vm2, %v1550_v61, 0.0 }
 0x3b9   : > { %744 = vrot.lane.b32.xlu1 %v2170_v9, %s1818_s24 }
 0x3c6   : > { %615 = vrot.lane.b32.xlu0 %v2170_v9, %s1819_s27  ;;  %s2293_s27 = scalar_lea.hbm %s2347_s9, %s1341_s21 }
 0x3ca   : > { %1010 = vrot.lane.b32.xlu0 %v2170_v9, %s1820_s26  ;;  %s1718_s26 = scalar_lea.vmem %s2295_s16, 128 }
 0x3cb   : > { %p1719_p2 = scmp.ne.s32.totalorder %s2295_s16, %s1718_s26 }
 0x3cd   : > { %p1720_p6 = pnand %p1719_p2, %p2379_p1 }
 0x3cf   : > { %p1721_p9 = pneg %p1720_p6 }
 0x3dd   : > { %1005 = vadd.xlane.f32.xlu1 %v1004_v62 }
 0x3ee   : > { %877 = vrot.lane.b32.xlu1 %v2170_v9, %s1821_s22  ;;  %s1825_s22 = smov [#allocation14]  }
 0x42d   : > { %v611_v63 = vpop.xlane.xlu0 %610 }
 0x42e   : > { %1551 = vrcp.f32 %v611_v63 }
 0x435   : > { %v740_v0 = vpop.xlane.xlu1 %739 }
 0x436   : > { %1553 = vrcp.f32 %v740_v0 }
 0x438   : > { %v1552_v2 = vpop.eup %1551 }
 0x439   : > { %v613_v4 = vmul.f32 %v1552_v2, %v1544_v50  ;;  %v745_v7 = vpop.permute.xlu1 %744 }
 0x43a   : > { %v750_v11 = vsel %vm620_vm9, %v745_v7, 0 }
 0x43b   : > { %v614_v8 = vpack.c.bf16 %v613_v4, %v613_v4 }
 0x43d   : > { %v873_v3 = vpop.xlane.xlu0 %872 }
 0x43e   : > { %1555 = vrcp.f32 %v873_v3 }
 0x440   : > { %v1554_v10 = vpop.eup %1553 }
 0x441   : > { %v616_v5 = vpop.permute.xlu0 %615  ;;  %v742_v9 = vmul.f32 %v1554_v10, %v1546_v54 }
 0x442   : > { %v622_v6 = vsel %vm620_vm9, %v616_v5, 0 }
 0x443   : > { %1381 = vmatpush3.bf16.msra.mxu0 %v622_v6  ;;  %v743_v12 = vpack.c.bf16 %v742_v9, %v742_v9 }
 0x444   : > { %1392 = vmatprep.subr.bf16.mxu0 %v1808_v1 }
 0x445   : > { %v1011_v18 = vpop.permute.xlu0 %1010 }
 0x446   : > { %1383 = vmatmul.mubr.msk.bf16.vlgmr.msra.gmra.mrb[4].mxu0 %vm539_vm2, %v614_v8  ;;  %v1016_v20 = vsel %vm620_vm9, %v1011_v18, 0 }
 0x447   : > { %1393 = vmatpush3.bf16.msra.mxu0 %v750_v11  ;;  %1394 = vmatprep.mubr.msk.bf16.mxu0 %vm1809_vm0, %v1808_v1 }
 0x448   : > { %1404 = vmatprep.subr.bf16.mxu0 %v1808_v1  ;;  %v1556_v13 = vpop.eup %1555 }
 0x449   : > { %v875_v15 = vmul.f32 %v1556_v13, %v1548_v56 }
 0x44b   : > { %v876_v19 = vpack.c.bf16 %v875_v15, %v875_v15 }
 0x44e   : > { %1395 = vmatmul.mubr.msk.bf16.vlgmr.msra.gmra.mrb[8].mxu0 %vm539_vm2, %v743_v12 }
 0x44f   : > { %1406 = vmatprep.mubr.msk.bf16.mxu0 %vm1809_vm0, %v1808_v1 }
 0x46a   : > { %v1006_v14 = vpop.xlane.xlu1 %1005 }
 0x46b   : > { %1557 = vrcp.f32 %v1006_v14 }
 0x46e   : > { %v878_v16 = vpop.permute.xlu1 %877 }
 0x46f   : > { %v883_v17 = vsel %vm620_vm9, %v878_v16, 0 }
 0x470   : > { %1405 = vmatpush3.bf16.msra.mxu0 %v883_v17 }
 0x471   : > { %1416 = vmatprep.subr.bf16.mxu0 %v1808_v1 }
 0x473   : > { %1407 = vmatmul.mubr.msk.bf16.vlgmr.msra.gmra.mrb[12].mxu0 %vm539_vm2, %v876_v19 }
 0x474   : > { %1417 = vmatpush3.bf16.msra.mxu0 %v1016_v20  ;;  %1418 = vmatprep.mubr.msk.bf16.mxu0 %vm1809_vm0, %v1808_v1 }
 0x475   : > { %v1558_v21 = vpop.eup %1557 }
 0x476   : > { %v1008_v22 = vmul.f32 %v1558_v21, %v1550_v61 }
 0x478   : > { %v1009_v23 = vpack.c.bf16 %v1008_v22, %v1008_v22 }
 0x47b   : > { %1419 = vmatmul.mubr.msk.bf16.vlgmr.msra.gmra.mrb[16].mxu0 %vm539_vm2, %v1009_v23 }
 0x519   : > { %v658_v24 = vpop.f32.mrb[4].mxu0 }
 0x51a   : > { %664 = vst.msk [vmem:[#allocation2] sm:$0xff] %vm539_vm2, %v658_v24  ;;  %v1384_v26 = vpop.f32.mrb[5].mxu0 }
 0x51b   : > { %v661_v27 = vpop.f32.mrb[6].mxu0 }
 0x51c   : > { %v1385_v28 = vpop.f32.mrb[7].mxu0 }
 0x521   : > { %v786_v29 = vpop.f32.mrb[8].mxu0 }
 0x522   : > { %793 = vrot.lane.b32.xlu1 %v786_v29, %s1822_s25  ;;  %v1396_v30 = vpop.f32.mrb[9].mxu0  ;;  %s1722_s25 = sshll.u32 %s1825_s22, 4  ;;  %s1723_s25 = int_to_ptr.vmem [resolvable:$false] %s1722_s25 }
 0x523   : > { %v789_v31 = vpop.f32.mrb[10].mxu0  ;;  %s1724_s5 = scalar_lea.vmem %s1723_s25, 256  ;;  %p1725_p12 = scmp.lt.s32.totalorder %s2295_s16, %s1723_s25 }
 0x524   : > { %v1397_v32 = vpop.f32.mrb[11].mxu0  ;;  %p1726_p7 = scmp.lt.s32.totalorder %s1724_s5, %s1718_s26 }
 0x526   : > { %p1727_p4 = por %p1726_p7, %p1725_p12 }
 0x528   : > { %p1728_p3 = pnand %p1727_p4, %p1721_p9 }
 0x546   : > { %v919_v35 = vpop.f32.mrb[12].mxu0 }
 0x547   : > { %926 = vrot.lane.b32.xlu0 %v919_v35, %s1823_s2  ;;  %v1408_v36 = vpop.f32.mrb[13].mxu0 }
 0x548   : > { %v922_v37 = vpop.f32.mrb[14].mxu0 }
 0x549   : > { %v1409_v38 = vpop.f32.mrb[15].mxu0 }
 0x54e   : > { %v1052_v39 = vpop.f32.mrb[16].mxu0 }
 0x54f   : > { %1059 = vrot.lane.b32.xlu1 %v1052_v39, %s1824_s7  ;;  %v1420_v40 = vpop.f32.mrb[17].mxu0 }
 0x550   : > { %v1055_v41 = vpop.f32.mrb[18].mxu0 }
 0x551   : > { %v1421_v42 = vpop.f32.mrb[19].mxu0 }
 0x594   : > { %v794_v43 = vpop.permute.xlu1 %793 }
 0x595   : > { %797 = vst.msk [vmem:[#allocation2] sm:$0xff] %vm796_vm10, %v794_v43 }
 0x5b9   : > { %v927_v1 = vpop.permute.xlu0 %926 }
 0x5ba   : > { %930 = vst.msk [vmem:[#allocation2] sm:$0xff] %vm929_vm11, %v927_v1 }
 0x5c1   : > { %v1060_v44 = vpop.permute.xlu1 %1059 }
 0x5c2   : > { %1063 = vst.msk [vmem:[#allocation2] sm:$0xff] %vm1062_vm12, %v1060_v44 }
 0x5c9   : > { %v1064_v45 = vld [vmem:[#allocation2] sm:$0xff] }
 0x5ca   : > { %v1065_v46 = vpack.c.bf16 %v1064_v45, %v1064_v45 }
 0x5cc   : > { %1427 = vmatmul.mubr.msk.bf16.vlgmr.msra.gmra.mrb[16].mxu1 %vm475_vm1, %v1065_v46 }
 0x69f   : > { %v1126_v25 = vpop.f32.mrb[16].mxu1 }
 0x6a0   : > { %v1127_v49 = vadd.f32 %v1336_v48, %v1126_v25  ;;  %v1428_v50 = vpop.f32.mrb[17].mxu1 }
 0x6a1   : > { %v1129_v51 = vpop.f32.mrb[18].mxu1 }
 0x6a2   : > { %v1429_v52 = vpop.f32.mrb[19].mxu1  ;;  %1132 = vst.msk [vmem:[%s446_s0] sm:$0xff] %vm475_vm1, %v1127_v49 }
 0x6a3   : > { %1731 = shalt.err (!%p1728_p3)
}
 0x6a4   : > { %s1732_s8 = scalar_lea.hbm %s2293_s27, 128  ;;  %s1736_s20 = scalar_lea.hbm %s2347_s9, 256 }
 0x6a5   : > { %p1733_p10 = scmp.ne.s32.totalorder %s2293_s27, %s1732_s8  ;;  %p1737_p11 = scmp.lt.u32.totalorder %s2293_s27, %s2347_s9 }
 0x6a6   : > { %p1738_p13 = scmp.lt.u32.totalorder %s1736_s20, %s1732_s8  ;;  %p1740_p2 = scmp.lt.u32.totalorder %s1732_s8, %s2293_s27 }
 0x6a7   : > { %p1734_p5 = pnand %p1733_p10, %p2379_p1 }
 0x6a8   : > { %p1739_p0 = por %p1738_p13, %p1737_p11 }
 0x6a9   : > { %p1735_p8 = pneg %p1734_p5 }
 0x6aa   : > { %p1741_p6 = por %p1740_p2, %p1739_p0 }
 0x6ac   : > { %p1742_p9 = pnand %p1741_p6, %p1735_p8 }
 0x6ae   : > { %1745 = shalt.err (!%p1742_p9)
}
 0x6af   : > { %1450 = dma.vmem_to_hbm [thread:$0]  (%p2379_p1), %s2295_s16, 128, %s2293_s27, %s1134_s15  }
 0x6b0 PF: > { %s1159_s28 = sand.u32 1, %s1788_s30   ;;  %p2380_p12 = scmp.ne.s32.totalorder %s2367_s18, 0 }
 0x6b1   : > { %p2381_p7 = scmp.ge.s32.totalorder %s1800_s12, 2  ;;  %s1160_s21 = scalar_lea.sflag [#allocation5], %s1159_s28 }
 0x6b3   : > { %p1473_p4 = pnand %p2381_p7, %p2380_p12 }
 0x6b5   : > { %1783 = dma.done.wait (!%p1473_p4), %s1160_s21, 128  }
 0x6b6   : > { %1785 = vsyncadd (!%p1473_p4), %s1160_s21, 4294967168  ;;  %p27_p3 = scmp.ge.s32.totalorder %s2014_s13, 4   ;;  %s2382_s30 = smov %s1792_s10 }
 0x6b7   : > { %s2383_s10 = smov %s1796_s11  ;;  %s2384_s11 = smov %s2025_s17 }
 0x6b8   : > { %s2385_s12 = smov %s2014_s13  ;;  %29 = sbr.rel (!%p27_p3) target bundleno = 15 (0xf), region = 134 }
 0x6bf   :  { %1165 = vsyncpa [#allocation4], 1 }
 0x6c0   :  { %1167 = vsyncpa [#allocation4 + $0x1], 1 }
 0x6c1   :  { %1168 = vsyncpa [#allocation8], 1 }
 0x6c2   :  { %1170 = vsyncpa [#allocation8 + $0x1], 1 }
 0x6c3   :  { %1171 = vsyncpa [#allocation11], 1 }
 0x6c4   :  { %1172 = vsyncpa [#allocation5], 1 }
 0x6c5   :  { %1174 = vsyncpa [#allocation5 + $0x1], 1 }
 0x6c6   :  { %1175 = vsyncpa [#allocation6], 1 }
 0x6c7   :  { %1177 = vsyncpa [#allocation6 + $0x1], 1 }

</bundles_post_ra>
